<compile_context>
chip_gen: v7x
topology: tpu7x:2x2x1
jax: 0.10.0
libtpu: 0.0.40
codegen_flags: <defaults>
</compile_context>

<pallas_src>
import jax
import jax.numpy as jnp
from jax.experimental import pallas as pl
from jax.experimental.pallas import tpu as pltpu


def down_kernel(x_ref, w1_ref, w2_ref, o_ref, pad_ref, patch_ref):
    # x_ref block: (NB, H, W, Cin) -- NB batch elements per grid step.
    NB, H, W, Cin = x_ref.shape
    Cout = w1_ref.shape[-1]
    Hp, Wp = H // 2, W // 2          # assumes even H, W (same as the PyTorch module use)
    M = NB * Hp * Wp

    x = x_ref[...].astype(jnp.float32)                     # no-op for f32 inputs

    # --- MaxPool2d(kernel=2, stride=2) ---
    t = x.reshape(NB, Hp, 2, W, Cin).max(axis=2)           # pool over H
    pooled = t.reshape(NB, Hp, Wp, 2, Cin).max(axis=3)     # pool over W -> (NB,Hp,Wp,Cin)

    # Zero the padded scratch each step: the 1-pixel halo must read as 0 for both
    # convs (the interior is overwritten below).  Re-zeroing every step keeps it
    # correct under megacore grid partitioning; it is ~3 KiB per image.
    pad_ref[...] = jnp.zeros_like(pad_ref)

    def conv3x3_relu(inp, w_ref):
        cin = inp.shape[-1]
        K = 9 * cin + 1                                    # +1 bias column
        # Write the unpadded image into the interior of the zero-haloed scratch.
        pad_ref[:, 1:1 + Hp, 1:1 + Wp, :cin] = inp
        # im2col: each of the 9 taps is a plain shifted slice load from the padded
        # ref, written into its column block of the patch matrix (no jnp.pad, no
        # per-tap matmul accumulation).
        for dh in range(3):
            for dw in range(3):
                tap = pad_ref[:, dh:dh + Hp, dw:dw + Wp, :cin]   # (NB, Hp, Wp, cin)
                col = (dh * 3 + dw) * cin
                patch_ref[:, col:col + cin] = tap.reshape(M, cin)
        patch_ref[:, K - 1:K] = jnp.ones((M, 1), jnp.float32)    # bias column
        # One wide-K MXU matmul: conv + bias in a single push.
        acc = jnp.dot(patch_ref[:, :K], w_ref[...],
                      preferred_element_type=jnp.float32)        # (M, Cout)
        return jnp.maximum(acc, 0.0)

    h1 = conv3x3_relu(pooled, w1_ref).reshape(NB, Hp, Wp, Cout)
    h2 = conv3x3_relu(h1, w2_ref)
    o_ref[...] = h2.reshape(NB, Hp, Wp, Cout).astype(o_ref.dtype)


@jax.jit
def down_forward(x_nhwc, w1, b1, w2, b2):
    N, H, W, Cin = x_nhwc.shape
    Cout = w1.shape[-1]
    Hp, Wp = H // 2, W // 2

    # Keep >= 2 grid steps (v7x has 2 TensorCores) while batching NB images per
    # step to amortize the ~0.35us fixed per-step pipeline overhead on v5e/v6e.
    G = 2 if (N % 2 == 0 and N >= 2) else N
    NB = N // G
    M = NB * Hp * Wp
    Cmax = max(Cin, Cout)
    K1, K2 = 9 * Cin + 1, 9 * Cout + 1

    # Pre-flatten HWIO weights to im2col matrices (row order = (kh, kw, cin)) and
    # append the bias as the last row, so the kernel needs no weight reshape and
    # no separate bias operand.
    w1_aug = jnp.concatenate([w1.reshape(9 * Cin, Cout), b1.reshape(1, Cout)],
                             axis=0).astype(jnp.float32)
    w2_aug = jnp.concatenate([w2.reshape(9 * Cout, Cout), b2.reshape(1, Cout)],
                             axis=0).astype(jnp.float32)

    return pl.pallas_call(
        down_kernel,
        out_shape=jax.ShapeDtypeStruct((N, Hp, Wp, Cout), x_nhwc.dtype),
        grid=(G,),
        in_specs=[
            pl.BlockSpec((NB, H, W, Cin), lambda g: (g, 0, 0, 0)),
            pl.BlockSpec((K1, Cout), lambda g: (0, 0)),
            pl.BlockSpec((K2, Cout), lambda g: (0, 0)),
        ],
        out_specs=pl.BlockSpec((NB, Hp, Wp, Cout), lambda g: (g, 0, 0, 0)),
        scratch_shapes=[
            pltpu.VMEM((NB, Hp + 2, Wp + 2, Cmax), jnp.float32),   # zero-haloed image
            pltpu.VMEM((M, max(K1, K2)), jnp.float32),             # im2col patch matrix
        ],
        compiler_params=pltpu.CompilerParams(
            dimension_semantics=("parallel",),
            vmem_limit_bytes=32 * 1024 * 1024,
        ),
    )(x_nhwc, w1_aug, w2_aug)


def _reference(x_nhwc, w1, b1, w2, b2):
    """Pure-JAX reference (maxpool + conv + relu, NHWC / HWIO)."""
    pooled = jax.lax.reduce_window(
        x_nhwc, -jnp.inf, jax.lax.max,
        window_dimensions=(1, 2, 2, 1), window_strides=(1, 2, 2, 1), padding="VALID")

    def conv(inp, w, b):
        out = jax.lax.conv_general_dilated(
            inp, w, window_strides=(1, 1), padding=((1, 1), (1, 1)),
            dimension_numbers=("NHWC", "HWIO", "NHWC"))
        return jax.nn.relu(out + b)

    return conv(conv(pooled, w1, b1), w2, b2)


if __name__ == "__main__":
    # Small shapes consistent with the module: batch=2, in_channels=4, out_channels=8, 16x16 spatial.
    N, Cin, Cout, H, W = 2, 4, 8, 16, 16

    key = jax.random.PRNGKey(0)
    kx, kw1, kb1, kw2, kb2 = jax.random.split(key, 5)

    # PyTorch-style NCHW input, converted to NHWC for the kernel.
    x_nchw = jax.random.normal(kx, (N, Cin, H, W), dtype=jnp.float32)
    x_nhwc = jnp.transpose(x_nchw, (0, 2, 3, 1))

    # Deterministic PyTorch-like Conv2d init: U(-1/sqrt(fan_in), 1/sqrt(fan_in)), weights in HWIO.
    def init_conv(kw, kb, cin, cout):
        bound = 1.0 / jnp.sqrt(cin * 3 * 3)
        w = jax.random.uniform(kw, (3, 3, cin, cout), jnp.float32, -bound, bound)
        b = jax.random.uniform(kb, (cout,), jnp.float32, -bound, bound)
        return w, b

    w1, b1 = init_conv(kw1, kb1, Cin, Cout)
    w2, b2 = init_conv(kw2, kb2, Cout, Cout)

    out = down_forward(x_nhwc, w1, b1, w2, b2)
    out = jax.block_until_ready(out)

    ref = _reference(x_nhwc, w1, b1, w2, b2)
    assert out.shape == (N, H // 2, W // 2, Cout)
    assert jnp.allclose(out, ref, atol=1e-5, rtol=1e-5), "mismatch vs JAX reference"

    print("KERNEL_OK")
</pallas_src>

<mosaic_0001>
module attributes {stable_mosaic.version = 11 : i64} {
  func.func @down_kernel(%arg0: i32, %arg1: memref<1x16x16x4xf32, #tpu.memory_space<vmem>>, %arg2: memref<37x8xf32, #tpu.memory_space<vmem>>, %arg3: memref<73x8xf32, #tpu.memory_space<vmem>>, %arg4: memref<1x8x8x8xf32, #tpu.memory_space<vmem>>, %arg5: memref<1x10x10x8xf32, #tpu.memory_space<vmem>>, %arg6: memref<64x73xf32, #tpu.memory_space<vmem>>) attributes {dimension_semantics = [#tpu.dimension_semantics<parallel>], iteration_bounds = array<i64: 2>, scalar_prefetch = 0 : i64, scratch_operands = 2 : i64, tpu.core_type = #tpu.core_type<tc>, window_params = [{transform_indices = @transform_0, window_bounds = array<i64: 1, 16, 16, 4>}, {pipeline_mode = #tpu.pipeline_mode<synchronous>, transform_indices = @transform_1, window_bounds = array<i64: 37, 8>}, {pipeline_mode = #tpu.pipeline_mode<synchronous>, transform_indices = @transform_2, window_bounds = array<i64: 73, 8>}, {transform_indices = @transform_3, window_bounds = array<i64: 1, 8, 8, 8>}]} {
    %c0 = arith.constant 0 : index
    %c0_0 = arith.constant 0 : index
    %c0_1 = arith.constant 0 : index
    %c0_2 = arith.constant 0 : index
    %0 = vector.load %arg1[%c0, %c0_0, %c0_1, %c0_2] : memref<1x16x16x4xf32, #tpu.memory_space<vmem>>, vector<1x16x16x4xf32>
    %1 = vector.shape_cast %0 : vector<1x16x16x4xf32> to vector<1x8x2x16x4xf32>
    %cst = arith.constant dense<0xFF800000> : vector<1x8x16x4xf32>
    %2 = vector.multi_reduction <maximumf>, %1, %cst [2] : vector<1x8x2x16x4xf32> to vector<1x8x16x4xf32>
    %3 = vector.shape_cast %2 : vector<1x8x16x4xf32> to vector<1x8x8x2x4xf32>
    %cst_3 = arith.constant dense<0xFF800000> : vector<1x8x8x4xf32>
    %4 = vector.multi_reduction <maximumf>, %3, %cst_3 [3] : vector<1x8x8x2x4xf32> to vector<1x8x8x4xf32>
    %cst_4 = arith.constant 0.000000e+00 : f32
    %5 = vector.broadcast %cst_4 : f32 to vector<1x10x10x8xf32>
    %c0_5 = arith.constant 0 : index
    %c0_6 = arith.constant 0 : index
    %c0_7 = arith.constant 0 : index
    %c0_8 = arith.constant 0 : index
    %6 = vector.load %arg5[%c0_5, %c0_6, %c0_7, %c0_8] : memref<1x10x10x8xf32, #tpu.memory_space<vmem>>, vector<1x10x10x8xf32>
    tpu.vector_store %arg5[%c0_5, %c0_6, %c0_7, %c0_8], %5 {strides = array<i32>} : memref<1x10x10x8xf32, #tpu.memory_space<vmem>>, vector<1x10x10x8xf32>,
    %c0_9 = arith.constant 0 : index
    %c1 = arith.constant 1 : index
    %c1_10 = arith.constant 1 : index
    %c0_11 = arith.constant 0 : index
    %7 = vector.load %arg5[%c0_9, %c1, %c1_10, %c0_11] : memref<1x10x10x8xf32, #tpu.memory_space<vmem>>, vector<1x8x8x4xf32>
    tpu.vector_store %arg5[%c0_9, %c1, %c1_10, %c0_11], %4 {strides = array<i32>} : memref<1x10x10x8xf32, #tpu.memory_space<vmem>>, vector<1x8x8x4xf32>,
    %c0_12 = arith.constant 0 : index
    %c0_13 = arith.constant 0 : index
    %c0_14 = arith.constant 0 : index
    %c0_15 = arith.constant 0 : index
    %8 = vector.load %arg5[%c0_12, %c0_13, %c0_14, %c0_15] : memref<1x10x10x8xf32, #tpu.memory_space<vmem>>, vector<1x8x8x4xf32>
    %9 = vector.shape_cast %8 : vector<1x8x8x4xf32> to vector<64x4xf32>
    %c0_16 = arith.constant 0 : index
    %c0_17 = arith.constant 0 : index
    %10 = vector.load %arg6[%c0_16, %c0_17] : memref<64x73xf32, #tpu.memory_space<vmem>>, vector<64x4xf32>
    tpu.vector_store %arg6[%c0_16, %c0_17], %9 {strides = array<i32>} : memref<64x73xf32, #tpu.memory_space<vmem>>, vector<64x4xf32>,
    %c0_18 = arith.constant 0 : index
    %c0_19 = arith.constant 0 : index
    %c1_20 = arith.constant 1 : index
    %c0_21 = arith.constant 0 : index
    %11 = vector.load %arg5[%c0_18, %c0_19, %c1_20, %c0_21] : memref<1x10x10x8xf32, #tpu.memory_space<vmem>>, vector<1x8x8x4xf32>
    %12 = vector.shape_cast %11 : vector<1x8x8x4xf32> to vector<64x4xf32>
    %c0_22 = arith.constant 0 : index
    %c4 = arith.constant 4 : index
    %13 = vector.load %arg6[%c0_22, %c4] : memref<64x73xf32, #tpu.memory_space<vmem>>, vector<64x4xf32>
    tpu.vector_store %arg6[%c0_22, %c4], %12 {strides = array<i32>} : memref<64x73xf32, #tpu.memory_space<vmem>>, vector<64x4xf32>,
    %c0_23 = arith.constant 0 : index
    %c0_24 = arith.constant 0 : index
    %c2 = arith.constant 2 : index
    %c0_25 = arith.constant 0 : index
    %14 = vector.load %arg5[%c0_23, %c0_24, %c2, %c0_25] : memref<1x10x10x8xf32, #tpu.memory_space<vmem>>, vector<1x8x8x4xf32>
    %15 = vector.shape_cast %14 : vector<1x8x8x4xf32> to vector<64x4xf32>
    %c0_26 = arith.constant 0 : index
    %c8 = arith.constant 8 : index
    %16 = vector.load %arg6[%c0_26, %c8] : memref<64x73xf32, #tpu.memory_space<vmem>>, vector<64x4xf32>
    tpu.vector_store %arg6[%c0_26, %c8], %15 {strides = array<i32>} : memref<64x73xf32, #tpu.memory_space<vmem>>, vector<64x4xf32>,
    %c0_27 = arith.constant 0 : index
    %c1_28 = arith.constant 1 : index
    %c0_29 = arith.constant 0 : index
    %c0_30 = arith.constant 0 : index
    %17 = vector.load %arg5[%c0_27, %c1_28, %c0_29, %c0_30] : memref<1x10x10x8xf32, #tpu.memory_space<vmem>>, vector<1x8x8x4xf32>
    %18 = vector.shape_cast %17 : vector<1x8x8x4xf32> to vector<64x4xf32>
    %c0_31 = arith.constant 0 : index
    %c12 = arith.constant 12 : index
    %19 = vector.load %arg6[%c0_31, %c12] : memref<64x73xf32, #tpu.memory_space<vmem>>, vector<64x4xf32>
    tpu.vector_store %arg6[%c0_31, %c12], %18 {strides = array<i32>} : memref<64x73xf32, #tpu.memory_space<vmem>>, vector<64x4xf32>,
    %c0_32 = arith.constant 0 : index
    %c1_33 = arith.constant 1 : index
    %c1_34 = arith.constant 1 : index
    %c0_35 = arith.constant 0 : index
    %20 = vector.load %arg5[%c0_32, %c1_33, %c1_34, %c0_35] : memref<1x10x10x8xf32, #tpu.memory_space<vmem>>, vector<1x8x8x4xf32>
    %21 = vector.shape_cast %20 : vector<1x8x8x4xf32> to vector<64x4xf32>
    %c0_36 = arith.constant 0 : index
    %c16 = arith.constant 16 : index
    %22 = vector.load %arg6[%c0_36, %c16] : memref<64x73xf32, #tpu.memory_space<vmem>>, vector<64x4xf32>
    tpu.vector_store %arg6[%c0_36, %c16], %21 {strides = array<i32>} : memref<64x73xf32, #tpu.memory_space<vmem>>, vector<64x4xf32>,
    %c0_37 = arith.constant 0 : index
    %c1_38 = arith.constant 1 : index
    %c2_39 = arith.constant 2 : index
    %c0_40 = arith.constant 0 : index
    %23 = vector.load %arg5[%c0_37, %c1_38, %c2_39, %c0_40] : memref<1x10x10x8xf32, #tpu.memory_space<vmem>>, vector<1x8x8x4xf32>
    %24 = vector.shape_cast %23 : vector<1x8x8x4xf32> to vector<64x4xf32>
    %c0_41 = arith.constant 0 : index
    %c20 = arith.constant 20 : index
    %25 = vector.load %arg6[%c0_41, %c20] : memref<64x73xf32, #tpu.memory_space<vmem>>, vector<64x4xf32>
    tpu.vector_store %arg6[%c0_41, %c20], %24 {strides = array<i32>} : memref<64x73xf32, #tpu.memory_space<vmem>>, vector<64x4xf32>,
    %c0_42 = arith.constant 0 : index
    %c2_43 = arith.constant 2 : index
    %c0_44 = arith.constant 0 : index
    %c0_45 = arith.constant 0 : index
    %26 = vector.load %arg5[%c0_42, %c2_43, %c0_44, %c0_45] : memref<1x10x10x8xf32, #tpu.memory_space<vmem>>, vector<1x8x8x4xf32>
    %27 = vector.shape_cast %26 : vector<1x8x8x4xf32> to vector<64x4xf32>
    %c0_46 = arith.constant 0 : index
    %c24 = arith.constant 24 : index
    %28 = vector.load %arg6[%c0_46, %c24] : memref<64x73xf32, #tpu.memory_space<vmem>>, vector<64x4xf32>
    tpu.vector_store %arg6[%c0_46, %c24], %27 {strides = array<i32>} : memref<64x73xf32, #tpu.memory_space<vmem>>, vector<64x4xf32>,
    %c0_47 = arith.constant 0 : index
    %c2_48 = arith.constant 2 : index
    %c1_49 = arith.constant 1 : index
    %c0_50 = arith.constant 0 : index
    %29 = vector.load %arg5[%c0_47, %c2_48, %c1_49, %c0_50] : memref<1x10x10x8xf32, #tpu.memory_space<vmem>>, vector<1x8x8x4xf32>
    %30 = vector.shape_cast %29 : vector<1x8x8x4xf32> to vector<64x4xf32>
    %c0_51 = arith.constant 0 : index
    %c28 = arith.constant 28 : index
    %31 = vector.load %arg6[%c0_51, %c28] : memref<64x73xf32, #tpu.memory_space<vmem>>, vector<64x4xf32>
    tpu.vector_store %arg6[%c0_51, %c28], %30 {strides = array<i32>} : memref<64x73xf32, #tpu.memory_space<vmem>>, vector<64x4xf32>,
    %c0_52 = arith.constant 0 : index
    %c2_53 = arith.constant 2 : index
    %c2_54 = arith.constant 2 : index
    %c0_55 = arith.constant 0 : index
    %32 = vector.load %arg5[%c0_52, %c2_53, %c2_54, %c0_55] : memref<1x10x10x8xf32, #tpu.memory_space<vmem>>, vector<1x8x8x4xf32>
    %33 = vector.shape_cast %32 : vector<1x8x8x4xf32> to vector<64x4xf32>
    %c0_56 = arith.constant 0 : index
    %c32 = arith.constant 32 : index
    %34 = vector.load %arg6[%c0_56, %c32] : memref<64x73xf32, #tpu.memory_space<vmem>>, vector<64x4xf32>
    tpu.vector_store %arg6[%c0_56, %c32], %33 {strides = array<i32>} : memref<64x73xf32, #tpu.memory_space<vmem>>, vector<64x4xf32>,
    %cst_57 = arith.constant 1.000000e+00 : f32
    %35 = vector.broadcast %cst_57 : f32 to vector<64x1xf32>
    %c0_58 = arith.constant 0 : index
    %c36 = arith.constant 36 : index
    %36 = vector.load %arg6[%c0_58, %c36] : memref<64x73xf32, #tpu.memory_space<vmem>>, vector<64x1xf32>
    tpu.vector_store %arg6[%c0_58, %c36], %35 {strides = array<i32>} : memref<64x73xf32, #tpu.memory_space<vmem>>, vector<64x1xf32>,
    %c0_59 = arith.constant 0 : index
    %c0_60 = arith.constant 0 : index
    %37 = vector.load %arg6[%c0_59, %c0_60] : memref<64x73xf32, #tpu.memory_space<vmem>>, vector<64x37xf32>
    %c0_61 = arith.constant 0 : index
    %c0_62 = arith.constant 0 : index
    %38 = vector.load %arg2[%c0_61, %c0_62] : memref<37x8xf32, #tpu.memory_space<vmem>>, vector<37x8xf32>
    %cst_63 = arith.constant dense<0.000000e+00> : vector<64x8xf32>
    %39 = tpu.matmul %37, %38, %cst_63 {dimension_numbers = #tpu.dot_dimension_numbers<[1], [0], [0], [1], [0, 0, 1, 1], [], []>} : vector<64x37xf32>, vector<37x8xf32>, vector<64x8xf32> -> vector<64x8xf32>
    %cst_64 = arith.constant 0.000000e+00 : f32
    %40 = vector.broadcast %cst_64 : f32 to vector<64x8xf32>
    %41 = arith.maximumf %39, %40 : vector<64x8xf32>
    %42 = vector.shape_cast %41 : vector<64x8xf32> to vector<1x8x8x8xf32>
    %c0_65 = arith.constant 0 : index
    %c1_66 = arith.constant 1 : index
    %c1_67 = arith.constant 1 : index
    %c0_68 = arith.constant 0 : index
    %43 = vector.load %arg5[%c0_65, %c1_66, %c1_67, %c0_68] : memref<1x10x10x8xf32, #tpu.memory_space<vmem>>, vector<1x8x8x8xf32>
    tpu.vector_store %arg5[%c0_65, %c1_66, %c1_67, %c0_68], %42 {strides = array<i32>} : memref<1x10x10x8xf32, #tpu.memory_space<vmem>>, vector<1x8x8x8xf32>,
    %c0_69 = arith.constant 0 : index
    %c0_70 = arith.constant 0 : index
    %c0_71 = arith.constant 0 : index
    %c0_72 = arith.constant 0 : index
    %44 = vector.load %arg5[%c0_69, %c0_70, %c0_71, %c0_72] : memref<1x10x10x8xf32, #tpu.memory_space<vmem>>, vector<1x8x8x8xf32>
    %45 = vector.shape_cast %44 : vector<1x8x8x8xf32> to vector<64x8xf32>
    %c0_73 = arith.constant 0 : index
    %c0_74 = arith.constant 0 : index
    %46 = vector.load %arg6[%c0_73, %c0_74] : memref<64x73xf32, #tpu.memory_space<vmem>>, vector<64x8xf32>
    tpu.vector_store %arg6[%c0_73, %c0_74], %45 {strides = array<i32>} : memref<64x73xf32, #tpu.memory_space<vmem>>, vector<64x8xf32>,
    %c0_75 = arith.constant 0 : index
    %c0_76 = arith.constant 0 : index
    %c1_77 = arith.constant 1 : index
    %c0_78 = arith.constant 0 : index
    %47 = vector.load %arg5[%c0_75, %c0_76, %c1_77, %c0_78] : memref<1x10x10x8xf32, #tpu.memory_space<vmem>>, vector<1x8x8x8xf32>
    %48 = vector.shape_cast %47 : vector<1x8x8x8xf32> to vector<64x8xf32>
    %c0_79 = arith.constant 0 : index
    %c8_80 = arith.constant 8 : index
    %49 = vector.load %arg6[%c0_79, %c8_80] : memref<64x73xf32, #tpu.memory_space<vmem>>, vector<64x8xf32>
    tpu.vector_store %arg6[%c0_79, %c8_80], %48 {strides = array<i32>} : memref<64x73xf32, #tpu.memory_space<vmem>>, vector<64x8xf32>,
    %c0_81 = arith.constant 0 : index
    %c0_82 = arith.constant 0 : index
    %c2_83 = arith.constant 2 : index
    %c0_84 = arith.constant 0 : index
    %50 = vector.load %arg5[%c0_81, %c0_82, %c2_83, %c0_84] : memref<1x10x10x8xf32, #tpu.memory_space<vmem>>, vector<1x8x8x8xf32>
    %51 = vector.shape_cast %50 : vector<1x8x8x8xf32> to vector<64x8xf32>
    %c0_85 = arith.constant 0 : index
    %c16_86 = arith.constant 16 : index
    %52 = vector.load %arg6[%c0_85, %c16_86] : memref<64x73xf32, #tpu.memory_space<vmem>>, vector<64x8xf32>
    tpu.vector_store %arg6[%c0_85, %c16_86], %51 {strides = array<i32>} : memref<64x73xf32, #tpu.memory_space<vmem>>, vector<64x8xf32>,
    %c0_87 = arith.constant 0 : index
    %c1_88 = arith.constant 1 : index
    %c0_89 = arith.constant 0 : index
    %c0_90 = arith.constant 0 : index
    %53 = vector.load %arg5[%c0_87, %c1_88, %c0_89, %c0_90] : memref<1x10x10x8xf32, #tpu.memory_space<vmem>>, vector<1x8x8x8xf32>
    %54 = vector.shape_cast %53 : vector<1x8x8x8xf32> to vector<64x8xf32>
    %c0_91 = arith.constant 0 : index
    %c24_92 = arith.constant 24 : index
    %55 = vector.load %arg6[%c0_91, %c24_92] : memref<64x73xf32, #tpu.memory_space<vmem>>, vector<64x8xf32>
    tpu.vector_store %arg6[%c0_91, %c24_92], %54 {strides = array<i32>} : memref<64x73xf32, #tpu.memory_space<vmem>>, vector<64x8xf32>,
    %c0_93 = arith.constant 0 : index
    %c1_94 = arith.constant 1 : index
    %c1_95 = arith.constant 1 : index
    %c0_96 = arith.constant 0 : index
    %56 = vector.load %arg5[%c0_93, %c1_94, %c1_95, %c0_96] : memref<1x10x10x8xf32, #tpu.memory_space<vmem>>, vector<1x8x8x8xf32>
    %57 = vector.shape_cast %56 : vector<1x8x8x8xf32> to vector<64x8xf32>
    %c0_97 = arith.constant 0 : index
    %c32_98 = arith.constant 32 : index
    %58 = vector.load %arg6[%c0_97, %c32_98] : memref<64x73xf32, #tpu.memory_space<vmem>>, vector<64x8xf32>
    tpu.vector_store %arg6[%c0_97, %c32_98], %57 {strides = array<i32>} : memref<64x73xf32, #tpu.memory_space<vmem>>, vector<64x8xf32>,
    %c0_99 = arith.constant 0 : index
    %c1_100 = arith.constant 1 : index
    %c2_101 = arith.constant 2 : index
    %c0_102 = arith.constant 0 : index
    %59 = vector.load %arg5[%c0_99, %c1_100, %c2_101, %c0_102] : memref<1x10x10x8xf32, #tpu.memory_space<vmem>>, vector<1x8x8x8xf32>
    %60 = vector.shape_cast %59 : vector<1x8x8x8xf32> to vector<64x8xf32>
    %c0_103 = arith.constant 0 : index
    %c40 = arith.constant 40 : index
    %61 = vector.load %arg6[%c0_103, %c40] : memref<64x73xf32, #tpu.memory_space<vmem>>, vector<64x8xf32>
    tpu.vector_store %arg6[%c0_103, %c40], %60 {strides = array<i32>} : memref<64x73xf32, #tpu.memory_space<vmem>>, vector<64x8xf32>,
    %c0_104 = arith.constant 0 : index
    %c2_105 = arith.constant 2 : index
    %c0_106 = arith.constant 0 : index
    %c0_107 = arith.constant 0 : index
    %62 = vector.load %arg5[%c0_104, %c2_105, %c0_106, %c0_107] : memref<1x10x10x8xf32, #tpu.memory_space<vmem>>, vector<1x8x8x8xf32>
    %63 = vector.shape_cast %62 : vector<1x8x8x8xf32> to vector<64x8xf32>
    %c0_108 = arith.constant 0 : index
    %c48 = arith.constant 48 : index
    %64 = vector.load %arg6[%c0_108, %c48] : memref<64x73xf32, #tpu.memory_space<vmem>>, vector<64x8xf32>
    tpu.vector_store %arg6[%c0_108, %c48], %63 {strides = array<i32>} : memref<64x73xf32, #tpu.memory_space<vmem>>, vector<64x8xf32>,
    %c0_109 = arith.constant 0 : index
    %c2_110 = arith.constant 2 : index
    %c1_111 = arith.constant 1 : index
    %c0_112 = arith.constant 0 : index
    %65 = vector.load %arg5[%c0_109, %c2_110, %c1_111, %c0_112] : memref<1x10x10x8xf32, #tpu.memory_space<vmem>>, vector<1x8x8x8xf32>
    %66 = vector.shape_cast %65 : vector<1x8x8x8xf32> to vector<64x8xf32>
    %c0_113 = arith.constant 0 : index
    %c56 = arith.constant 56 : index
    %67 = vector.load %arg6[%c0_113, %c56] : memref<64x73xf32, #tpu.memory_space<vmem>>, vector<64x8xf32>
    tpu.vector_store %arg6[%c0_113, %c56], %66 {strides = array<i32>} : memref<64x73xf32, #tpu.memory_space<vmem>>, vector<64x8xf32>,
    %c0_114 = arith.constant 0 : index
    %c2_115 = arith.constant 2 : index
    %c2_116 = arith.constant 2 : index
    %c0_117 = arith.constant 0 : index
    %68 = vector.load %arg5[%c0_114, %c2_115, %c2_116, %c0_117] : memref<1x10x10x8xf32, #tpu.memory_space<vmem>>, vector<1x8x8x8xf32>
    %69 = vector.shape_cast %68 : vector<1x8x8x8xf32> to vector<64x8xf32>
    %c0_118 = arith.constant 0 : index
    %c64 = arith.constant 64 : index
    %70 = vector.load %arg6[%c0_118, %c64] : memref<64x73xf32, #tpu.memory_space<vmem>>, vector<64x8xf32>
    tpu.vector_store %arg6[%c0_118, %c64], %69 {strides = array<i32>} : memref<64x73xf32, #tpu.memory_space<vmem>>, vector<64x8xf32>,
    %cst_119 = arith.constant 1.000000e+00 : f32
    %71 = vector.broadcast %cst_119 : f32 to vector<64x1xf32>
    %c0_120 = arith.constant 0 : index
    %c72 = arith.constant 72 : index
    %72 = vector.load %arg6[%c0_120, %c72] : memref<64x73xf32, #tpu.memory_space<vmem>>, vector<64x1xf32>
    tpu.vector_store %arg6[%c0_120, %c72], %71 {strides = array<i32>} : memref<64x73xf32, #tpu.memory_space<vmem>>, vector<64x1xf32>,
    %c0_121 = arith.constant 0 : index
    %c0_122 = arith.constant 0 : index
    %73 = vector.load %arg6[%c0_121, %c0_122] : memref<64x73xf32, #tpu.memory_space<vmem>>, vector<64x73xf32>
    %c0_123 = arith.constant 0 : index
    %c0_124 = arith.constant 0 : index
    %74 = vector.load %arg3[%c0_123, %c0_124] : memref<73x8xf32, #tpu.memory_space<vmem>>, vector<73x8xf32>
    %cst_125 = arith.constant dense<0.000000e+00> : vector<64x8xf32>
    %75 = tpu.matmul %73, %74, %cst_125 {dimension_numbers = #tpu.dot_dimension_numbers<[1], [0], [0], [1], [0, 0, 1, 1], [], []>} : vector<64x73xf32>, vector<73x8xf32>, vector<64x8xf32> -> vector<64x8xf32>
    %cst_126 = arith.constant 0.000000e+00 : f32
    %76 = vector.broadcast %cst_126 : f32 to vector<64x8xf32>
    %77 = arith.maximumf %75, %76 : vector<64x8xf32>
    %78 = vector.shape_cast %77 : vector<64x8xf32> to vector<1x8x8x8xf32>
    %c0_127 = arith.constant 0 : index
    %c0_128 = arith.constant 0 : index
    %c0_129 = arith.constant 0 : index
    %c0_130 = arith.constant 0 : index
    %79 = vector.load %arg4[%c0_127, %c0_128, %c0_129, %c0_130] : memref<1x8x8x8xf32, #tpu.memory_space<vmem>>, vector<1x8x8x8xf32>
    tpu.vector_store %arg4[%c0_127, %c0_128, %c0_129, %c0_130], %78 {strides = array<i32>} : memref<1x8x8x8xf32, #tpu.memory_space<vmem>>, vector<1x8x8x8xf32>,
    return
  }
  func.func @transform_0(%arg0: i32) -> (i32, i32, i32, i32) {
    %c0_i32 = arith.constant 0 : i32
    %c0_i32_0 = arith.constant 0 : i32
    %c0_i32_1 = arith.constant 0 : i32
    %c0_i32_2 = arith.constant 0 : i32
    return %arg0, %c0_i32, %c0_i32_0, %c0_i32_1 : i32, i32, i32, i32
  }
  func.func @transform_1(%arg0: i32) -> (i32, i32) {
    %c0_i32 = arith.constant 0 : i32
    %c0_i32_0 = arith.constant 0 : i32
    %c0_i32_1 = arith.constant 0 : i32
    return %c0_i32, %c0_i32_0 : i32, i32
  }
  func.func @transform_2(%arg0: i32) -> (i32, i32) {
    %c0_i32 = arith.constant 0 : i32
    %c0_i32_0 = arith.constant 0 : i32
    %c0_i32_1 = arith.constant 0 : i32
    return %c0_i32, %c0_i32_0 : i32, i32
  }
  func.func @transform_3(%arg0: i32) -> (i32, i32, i32, i32) {
    %c0_i32 = arith.constant 0 : i32
    %c0_i32_0 = arith.constant 0 : i32
    %c0_i32_1 = arith.constant 0 : i32
    %c0_i32_2 = arith.constant 0 : i32
    return %arg0, %c0_i32, %c0_i32_0, %c0_i32_1 : i32, i32, i32, i32
  }
}

</mosaic_0001>

<bundles_post_ra>
// kernel: down_forward.1
= control target key start
LH: loop header
LB: loop body
LE: loop exit
PB: predicated region body
PF: predicated region fallthrough
CT: control target
= control target key end

     0   :  { %8 = vsyncpa [#allocation5], 0  ;;  %s3650_s0 = inlined_call_operand.vmem [shape: f32[2,16,16,4], index: 0, kind: input, shape index: {}]   ;;  %s3651_s1 = inlined_call_operand.vmem [shape: f32[37,8], index: 1, kind: input, shape index: {}]   ;;  %s3652_s2 = inlined_call_operand.vmem [shape: f32[73,8], index: 2, kind: input, shape index: {}]   ;;  %s3653_s3 = inlined_call_operand.hbm [shape: f32[2,8,8,8], index: 3, kind: output, shape index: {}]  }
   0x1   :  { %10 = vsyncpa [#allocation5 + $0x1], 0  ;;  %s2764_s12 = smov 0   ;;  %s2766_s13 = smov 0  }
   0x2   :  { %s2768_s14 = smov 0   ;;  %s2770_s15 = smov 0  }
   0x3 LB: > { %s2785_s16 = sadd.s32 4294967295, %s2724_s15   ;;  %s2459_s17 = sadd.s32 4294967294, %s2724_s15   ;;  %s2724_s15 = sphi %s2770_s15, %s3659_s15   ;;  %s2720_s14 = sphi %s2768_s14, %s3658_s14   ;;  %s2716_s13 = sphi %s2766_s13, %s3657_s13   ;;  %s2712_s12 = sphi %s2764_s12, %s3656_s12  }
   0x4   : > { %s2789_s18 = sadd.s32 1, %s2724_s15   ;;  %s91_s19 = sadd.s32 1, %s2720_s14 }
   0x5   : > { %s88_s20 = ssub.s32 %s2724_s15, %s2789_s18  ;;  %p101_p0 = scmp.ne.s32.totalorder %s2720_s14, %s2716_s13 }
   0x6   : > { %p89_p1 = scmp.eq.s32.totalorder %s88_s20, 0  ;;  %p102_p2 = scmp.eq.s32.totalorder %s2785_s16, 1 }
   0x7   : > { %p107_p3 = scmp.ne.s32.totalorder %s2716_s13, %s2712_s12  ;;  %p108_p4 = scmp.eq.s32.totalorder %s2459_s17, 1 }
   0x8   : > { %s2800_s21 = scalar_select %p89_p1, %s2720_s14, %s91_s19  }
   0x9   : > { %p2802_p5 = por %p102_p2, %p101_p0  ;;  %p2806_p6 = por %p108_p4, %p107_p3 }
   0xa   : > { %p2462_p7 = scmp.ge.s32.totalorder %s2724_s15, 1  ;;  %p140_p8 = scmp.lt.s32.totalorder %s2724_s15, 3 }
   0xc   : > { %p141_p9 = pnand %p2462_p7, %p140_p8 }
   0xd   : > { %vm1051_vm0 = vcmask (!%p141_p9), 64512   ;;  %vm1053_vm1 = vcmask (!%p141_p9), 58368   ;;  %v2726_v0 = vmov (!%p141_p9), 0.0   ;;  %p164_p10 = scmp.lt.s32.totalorder (!%p141_p9), %s2785_s16, 1  ;;  %v270_v1 = vlaneseq (!%p141_p9)  ;;  %s2728_s29 = smov (!%p141_p9), 4  }
   0xe   : > { %144 = sbr.rel (%p141_p9) target bundleno = 979 (0x3d3), region = 32  ;;  %1052 = vst.msk [vmem:[#allocation2] sm:$0xff] (!%p141_p9), %vm1051_vm0, %v2726_v0  ;;  %1055 = vst.msk [vmem:[#allocation2 + $0x10] sm:$0xff] (!%p141_p9), %vm1051_vm0, %v2726_v0  ;;  %v2727_v2 = vmov (!%p141_p9), 1983009808   ;;  %vm201_vm2 = vcmask (!%p141_p9), 31744  }
   0xf   : > { %1054 = vst.msk [vmem:[#allocation2 + $0x8] sm:$0x3] (!%p141_p9), %vm1053_vm1, %v2726_v0  ;;  %1056 = vst.msk [vmem:[#allocation2 + $0x18] sm:$0x3] (!%p141_p9), %vm1053_vm1, %v2726_v0  ;;  %v268_v3 = vunpack.c.l.s4 (!%p141_p9), %v2727_v2  ;;  %v271_v4 = vshrl.u32 (!%p141_p9), %v270_v1, 7  ;;  %s2729_s30 = smov (!%p141_p9), 8  }
  0x10   : > { %1057 = vst.msk [vmem:[#allocation2 + $0x20] sm:$0xff] (!%p141_p9), %vm1051_vm0, %v2726_v0  ;;  %1059 = vst.msk [vmem:[#allocation2 + $0x30] sm:$0xff] (!%p141_p9), %vm1051_vm0, %v2726_v0  ;;  %vm602_vm3 = vcmask (!%p141_p9), 25600   ;;  %vm1137_vm4 = vcmask (!%p141_p9), 1041409   ;;  %vm1139_vm5 = vcmask (!%p141_p9), 1042434   ;;  %vm1141_vm6 = vcmask (!%p141_p9), 1043459  }
  0x11   : > { %1058 = vst.msk [vmem:[#allocation2 + $0x28] sm:$0x3] (!%p141_p9), %vm1053_vm1, %v2726_v0  ;;  %1060 = vst.msk [vmem:[#allocation2 + $0x38] sm:$0x3] (!%p141_p9), %vm1053_vm1, %v2726_v0  ;;  %v269_v5 = vunpack.c.0.s8 (!%p141_p9), %v268_v3  ;;  %vm1143_vm7 = vcmask (!%p141_p9), 1044484   ;;  %vm1145_vm8 = vcmask (!%p141_p9), 1045509  }
  0x12   : > { %1061 = vst.msk [vmem:[#allocation2 + $0x40] sm:$0xff] (!%p141_p9), %vm1051_vm0, %v2726_v0  ;;  %1063 = vst.msk [vmem:[#allocation2 + $0x50] sm:$0xff] (!%p141_p9), %vm1051_vm0, %v2726_v0  ;;  %vm1147_vm9 = vcmask (!%p141_p9), 1046534   ;;  %vm1149_vm10 = vcmask (!%p141_p9), 1047559   ;;  %s2730_s4 = smov (!%p141_p9), 12   ;;  %s2731_s5 = smov (!%p141_p9), 16  }
  0x13   : > { %1062 = vst.msk [vmem:[#allocation2 + $0x48] sm:$0x3] (!%p141_p9), %vm1053_vm1, %v2726_v0  ;;  %1064 = vst.msk [vmem:[#allocation2 + $0x58] sm:$0x3] (!%p141_p9), %vm1053_vm1, %v2726_v0  ;;  %v2842_v9 = vsub.s32 (!%p141_p9), %v269_v5, %v271_v4  ;;  %s2732_s6 = smov (!%p141_p9), 20   ;;  %s2733_s7 = smov (!%p141_p9), 24  }
  0x14   : > { %1065 = vst.msk [vmem:[#allocation2 + $0x60] sm:$0xff] (!%p141_p9), %vm1051_vm0, %v2726_v0  ;;  %1067 = vst.msk [vmem:[#allocation2 + $0x70] sm:$0xff] (!%p141_p9), %vm1051_vm0, %v2726_v0  ;;  %s2734_s8 = smov (!%p141_p9), 28   ;;  %s2735_s9 = smov (!%p141_p9), 32   ;;  %vm1273_vm11 = vcmask (!%p141_p9), 64544   ;;  %vm1322_vm12 = vcmask (!%p141_p9), 97344  }
  0x15   : > { %1066 = vst.msk [vmem:[#allocation2 + $0x68] sm:$0x3] %vm1053_vm1, %v2726_v0  ;;  %1068 = vst.msk [vmem:[#allocation2 + $0x78] sm:$0x3] %vm1053_vm1, %v2726_v0  ;;  %s165_s24 = scalar_select %p164_p10, %s2785_s16, 1  ;;  %vm1371_vm13 = vcmask 130144  }
  0x16   : > { %1069 = vst.msk [vmem:[#allocation2 + $0x80] sm:$0xff] %vm1051_vm0, %v2726_v0  ;;  %1071 = vst.msk [vmem:[#allocation2 + $0x90] sm:$0xff] %vm1051_vm0, %v2726_v0  ;;  %v1233_v10 = vld [vmem:[#allocation2 + $0x1] sm:$0xff]  ;;  %vm1420_vm14 = vcmask 162944   ;;  %vm1673_vm15 = vcmask 1044480  }
  0x17   : > { %1070 = vst.msk [vmem:[#allocation2 + $0x88] sm:$0x3] %vm1053_vm1, %v2726_v0  ;;  %1072 = vst.msk [vmem:[#allocation2 + $0x98] sm:$0x3] %vm1053_vm1, %v2726_v0  ;;  %s2489_s25 = sshll.u32 %s165_s24, 8  ;;  %v1282_v11 = vld [vmem:[#allocation2 + $0x2] sm:$0xff]  ;;  %1249 = vrot.lane.b32.xlu0 %v1233_v10, %s2728_s29 }
  0x18   : > { %s2837_s28 = scalar_lea.vmem %s3650_s0, %s2489_s25  ;;  %1298 = vrot.lane.b32.xlu1 %v1282_v11, %s2729_s30  ;;  %vm1469_vm1 = vcmask 195744  }
  0x19   : > { %v169_v6 = vld [vmem:[%s2837_s28] sm:$0xff]  ;;  %v170_v7 = vld [vmem:[%s2837_s28 + $0x8] sm:$0xff]  ;;  %v171_v8 = vld [vmem:[%s2837_s28 + $0x10] sm:$0xff] }
  0x1a   : > { %v172_v12 = vld [vmem:[%s2837_s28 + $0x18] sm:$0xff]  ;;  %v202_v13 = vsel %vm201_vm2, %v169_v6, -inf  ;;  %v203_v14 = vsel %vm201_vm2, %v171_v8, -inf  ;;  %v205_v15 = vsel %vm201_vm2, %v170_v7, -inf  ;;  %v173_v18 = vld [vmem:[%s2837_s28 + $0x20] sm:$0xff]  ;;  %v174_v19 = vld [vmem:[%s2837_s28 + $0x28] sm:$0xff] }
  0x1b   : > { %v204_v16 = vmax.f32 %v202_v13, %v203_v14  ;;  %v206_v17 = vsel %vm201_vm2, %v172_v12, -inf  ;;  %v175_v21 = vld [vmem:[%s2837_s28 + $0x30] sm:$0xff]  ;;  %v176_v22 = vld [vmem:[%s2837_s28 + $0x38] sm:$0xff]  ;;  %v208_v23 = vsel %vm201_vm2, %v173_v18, -inf  ;;  %v211_v24 = vsel %vm201_vm2, %v174_v19, -inf  ;;  %v177_v25 = vld [vmem:[%s2837_s28 + $0x40] sm:$0xff] }
  0x1c   : > { %v207_v20 = vmax.f32 %v205_v15, %v206_v17  ;;  %v209_v28 = vsel %vm201_vm2, %v175_v21, -inf  ;;  %v212_v29 = vsel %vm201_vm2, %v176_v22, -inf  ;;  %v2869_v37 = vsel %vm201_vm2, %v177_v25, -inf }
  0x1d   : > { %v266_v26 = vcombine.high %v204_v16, %v204_v16  ;;  %v273_v27 = vrot.slane %v204_v16, %v2842_v9  ;;  %v2862_v32 = vmax.f32 %v208_v23, %v209_v28  ;;  %v2864_v33 = vmax.f32 %v211_v24, %v212_v29 }
  0x1e   : > { %v283_v30 = vcombine.high %v207_v20, %v207_v20  ;;  %v290_v31 = vrot.slane %v207_v20, %v2842_v9 }
  0x1f   : > { %v280_v34 = vrot.slane %v266_v26, %v2842_v9  ;;  %v281_v35 = vcombine.high %v273_v27, %v273_v27  ;;  %v603_v36 = vsel %vm602_vm3, %v273_v27, -inf  ;;  %v300_v26 = vcombine.high %v2862_v32, %v2862_v32 }
  0x20   : > { %v297_v38 = vrot.slane %v283_v30, %v2842_v9  ;;  %v298_v39 = vcombine.high %v290_v31, %v290_v31  ;;  %v604_v40 = vrot.slane %v603_v36, 4  ;;  %v631_v41 = vsel %vm602_vm3, %v290_v31, -inf }
  0x21   : > { %v282_v42 = vcombine.high %v280_v34, %v280_v34  ;;  %v610_v43 = vsel %vm602_vm3, %v281_v35, -inf  ;;  %v617_v44 = vsel %vm602_vm3, %v280_v34, -inf  ;;  %v632_v45 = vrot.slane %v631_v41, 4 }
  0x22   : > { %v299_v46 = vcombine.high %v297_v38, %v297_v38  ;;  %v605_v47 = vmax.f32 %v603_v36, %v604_v40  ;;  %v611_v48 = vrot.slane %v610_v43, 4  ;;  %v618_v49 = vrot.slane %v617_v44, 4 }
  0x23   : > { %v624_v50 = vsel %vm602_vm3, %v282_v42, -inf  ;;  %v633_v51 = vmax.f32 %v631_v41, %v632_v45  ;;  %v638_v52 = vsel %vm602_vm3, %v298_v39, -inf  ;;  %v645_v53 = vsel %vm602_vm3, %v297_v38, -inf }
  0x24   : > { %v606_v54 = vrot.slane %v605_v47, 2  ;;  %v612_v55 = vmax.f32 %v610_v43, %v611_v48  ;;  %v619_v56 = vmax.f32 %v617_v44, %v618_v49  ;;  %v625_v57 = vrot.slane %v624_v50, 4 }
  0x25   : > { %v634_v58 = vrot.slane %v633_v51, 2  ;;  %v639_v59 = vrot.slane %v638_v52, 4  ;;  %v646_v60 = vrot.slane %v645_v53, 4  ;;  %v652_v61 = vsel %vm602_vm3, %v299_v46, -inf }
  0x26   : > { %v607_v62 = vmax.f32 %v605_v47, %v606_v54  ;;  %v613_v63 = vrot.slane %v612_v55, 2  ;;  %v620_v0 = vrot.slane %v619_v56, 2  ;;  %v626_v1 = vmax.f32 %v624_v50, %v625_v57 }
  0x27   : > { %v635_v2 = vmax.f32 %v633_v51, %v634_v58  ;;  %v640_v3 = vmax.f32 %v638_v52, %v639_v59  ;;  %v647_v4 = vmax.f32 %v645_v53, %v646_v60  ;;  %v653_v5 = vrot.slane %v652_v61, 4 }
  0x28   : > { %v608_v6 = vrot.slane %v607_v62, 1  ;;  %v614_v7 = vmax.f32 %v612_v55, %v613_v63  ;;  %v621_v8 = vmax.f32 %v619_v56, %v620_v0  ;;  %v627_v10 = vrot.slane %v626_v1, 2 }
  0x29   : > { %v636_v11 = vrot.slane %v635_v2, 1  ;;  %v641_v12 = vrot.slane %v640_v3, 2  ;;  %v648_v13 = vrot.slane %v647_v4, 2  ;;  %v654_v14 = vmax.f32 %v652_v61, %v653_v5 }
  0x2a   : > { %v609_v15 = vmax.f32 %v607_v62, %v608_v6  ;;  %v615_v16 = vrot.slane %v614_v7, 1  ;;  %v622_v17 = vrot.slane %v621_v8, 1  ;;  %v628_v18 = vmax.f32 %v626_v1, %v627_v10 }
  0x2b   : > { %v637_v19 = vmax.f32 %v635_v2, %v636_v11  ;;  %v642_v20 = vmax.f32 %v640_v3, %v641_v12  ;;  %v649_v21 = vmax.f32 %v647_v4, %v648_v13  ;;  %v655_v22 = vrot.slane %v654_v14, 2 }
  0x2c   : > { %v616_v23 = vmax.f32 %v614_v7, %v615_v16  ;;  %v623_v24 = vmax.f32 %v621_v8, %v622_v17  ;;  %v629_v25 = vrot.slane %v628_v18, 1  ;;  %v307_v30 = vrot.slane %v2862_v32, %v2842_v9 }
  0x2d   : > { %v643_v27 = vrot.slane %v642_v20, 1  ;;  %v650_v28 = vrot.slane %v649_v21, 1  ;;  %v656_v29 = vmax.f32 %v654_v14, %v655_v22  ;;  %v314_v35 = vrot.slane %v300_v26, %v2842_v9 }
  0x2e   : > { %v630_v31 = vmax.f32 %v628_v18, %v629_v25  ;;  %v1138_v34 = vsel %vm1137_vm4, %v616_v23, %v609_v15  ;;  %v317_v36 = vcombine.high %v2864_v33, %v2864_v33  ;;  %v315_v43 = vcombine.high %v307_v30, %v307_v30  ;;  %v179_v25 = vld [vmem:[%s2837_s28 + $0x50] sm:$0xff] }
  0x2f   : > { %v644_v38 = vmax.f32 %v642_v20, %v643_v27  ;;  %v651_v39 = vmax.f32 %v649_v21, %v650_v28  ;;  %v657_v40 = vrot.slane %v656_v29, 1  ;;  %v1140_v41 = vsel %vm1139_vm5, %v623_v24, %v1138_v34 }
  0x30   : > { %v1142_v42 = vsel %vm1141_vm6, %v630_v31, %v1140_v41  ;;  %v316_v44 = vcombine.high %v314_v35, %v314_v35  ;;  %v324_v32 = vrot.slane %v2864_v33, %v2842_v9  ;;  %v331_v47 = vrot.slane %v317_v36, %v2842_v9 }
  0x31   : > { %v658_v45 = vmax.f32 %v656_v29, %v657_v40  ;;  %v1144_v46 = vsel %vm1143_vm7, %v637_v19, %v1142_v42  ;;  %v659_v48 = vsel %vm602_vm3, %v307_v30, -inf  ;;  %v666_v52 = vsel %vm602_vm3, %v315_v43, -inf  ;;  %v178_v43 = vld [vmem:[%s2837_s28 + $0x48] sm:$0xff] }
  0x32   : > { %v1146_v49 = vsel %vm1145_vm8, %v644_v38, %v1144_v46  ;;  %v332_v50 = vcombine.high %v324_v32, %v324_v32  ;;  %v660_v51 = vrot.slane %v659_v48, 4  ;;  %v333_v54 = vcombine.high %v331_v47, %v331_v47 }
  0x33   : > { %v1148_v53 = vsel %vm1147_vm9, %v651_v39, %v1146_v49  ;;  %v667_v55 = vrot.slane %v666_v52, 4  ;;  %v673_v56 = vsel %vm602_vm3, %v314_v35, -inf  ;;  %v680_v59 = vsel %vm602_vm3, %v316_v44, -inf }
  0x34   : > { %v1150_v33 = vsel %vm1149_vm10, %v658_v45, %v1148_v53  ;;  %v661_v57 = vmax.f32 %v659_v48, %v660_v51  ;;  %v674_v58 = vrot.slane %v673_v56, 4  ;;  %v681_v61 = vrot.slane %v680_v59, 4  ;;  %v180_v48 = vld [vmem:[%s2837_s28 + $0x58] sm:$0xff] }
  0x35   : > { %1209 = vst.msk [vmem:[#allocation2 + $0x11] sm:$0xff] %vm201_vm2, %v1150_v33  ;;  %v668_v60 = vmax.f32 %v666_v52, %v667_v55  ;;  %v687_v62 = vsel %vm602_vm3, %v324_v32, -inf  ;;  %v694_v63 = vsel %vm602_vm3, %v332_v50, -inf  ;;  %v701_v6 = vsel %vm602_vm3, %v331_v47, -inf  ;;  %v181_v33 = vld [vmem:[%s2837_s28 + $0x60] sm:$0xff] }
  0x36   : > { %v662_v0 = vrot.slane %v661_v57, 2  ;;  %v675_v1 = vmax.f32 %v673_v56, %v674_v58  ;;  %v688_v2 = vrot.slane %v687_v62, 4  ;;  %v695_v3 = vrot.slane %v694_v63, 4 }
  0x37   : > { %v669_v4 = vrot.slane %v668_v60, 2  ;;  %v682_v5 = vmax.f32 %v680_v59, %v681_v61  ;;  %v708_v7 = vsel %vm602_vm3, %v333_v54, -inf  ;;  %v702_v15 = vrot.slane %v701_v6, 4 }
  0x38   : > { %v663_v8 = vmax.f32 %v661_v57, %v662_v0  ;;  %v676_v10 = vrot.slane %v675_v1, 2  ;;  %v689_v11 = vmax.f32 %v687_v62, %v688_v2  ;;  %v696_v12 = vmax.f32 %v694_v63, %v695_v3 }
  0x39   : > { %v670_v13 = vmax.f32 %v668_v60, %v669_v4  ;;  %v683_v14 = vrot.slane %v682_v5, 2  ;;  %v709_v16 = vrot.slane %v708_v7, 4  ;;  %v703_v23 = vmax.f32 %v701_v6, %v702_v15 }
  0x3a   : > { %v664_v17 = vrot.slane %v663_v8, 1  ;;  %v677_v18 = vmax.f32 %v675_v1, %v676_v10  ;;  %v690_v19 = vrot.slane %v689_v11, 2  ;;  %v697_v20 = vrot.slane %v696_v12, 2 }
  0x3b   : > { %v671_v21 = vrot.slane %v670_v13, 1  ;;  %v684_v22 = vmax.f32 %v682_v5, %v683_v14  ;;  %v710_v24 = vmax.f32 %v708_v7, %v709_v16  ;;  %v704_v36 = vrot.slane %v703_v23, 2 }
  0x3c   : > { %v2906_v26 = vld [vmem:[#allocation2 + $0x12] sm:$0xff]  ;;  %v665_v28 = vmax.f32 %v663_v8, %v664_v17  ;;  %v678_v29 = vrot.slane %v677_v18, 1  ;;  %v691_v30 = vmax.f32 %v689_v11, %v690_v19  ;;  %v698_v31 = vmax.f32 %v696_v12, %v697_v20 }
  0x3d   : > { %v1234_v27 = vld [vmem:[#allocation2 + $0x11] sm:$0xff]  ;;  %1300 = vrot.lane.b32.xlu1 %v2906_v26, %s2729_s30  ;;  %v672_v34 = vmax.f32 %v670_v13, %v671_v21  ;;  %v685_v35 = vrot.slane %v684_v22, 1  ;;  %v711_v38 = vrot.slane %v710_v24, 2  ;;  %v215_v44 = vsel %vm201_vm2, %v179_v25, -inf }
  0x3e   : > { %1251 = vrot.lane.b32.xlu0 %v1234_v27, %s2728_s29  ;;  %v679_v39 = vmax.f32 %v677_v18, %v678_v29  ;;  %v692_v40 = vrot.slane %v691_v30, 1  ;;  %v699_v41 = vrot.slane %v698_v31, 1  ;;  %v1331_v42 = vld [vmem:[#allocation2 + $0x10] sm:$0xff]  ;;  %v705_v45 = vmax.f32 %v703_v23, %v704_v36 }
  0x3f   : > { %v686_v32 = vmax.f32 %v684_v22, %v685_v35  ;;  %v712_v46 = vmax.f32 %v710_v24, %v711_v38  ;;  %v1151_v47 = vsel %vm1137_vm4, %v672_v34, %v665_v28  ;;  %v216_v52 = vmax.f32 %v2869_v37, %v215_v44  ;;  %v183_v8 = vld [vmem:[%s2837_s28 + $0x70] sm:$0xff] }
  0x40   : > { %v693_v49 = vmax.f32 %v691_v30, %v692_v40  ;;  %v700_v50 = vmax.f32 %v698_v31, %v699_v41  ;;  %v1152_v51 = vsel %vm1139_vm5, %v679_v39, %v1151_v47  ;;  %v706_v53 = vrot.slane %v705_v45, 1 }
  0x41   : > { %v713_v54 = vrot.slane %v712_v46, 1  ;;  %v1153_v55 = vsel %vm1141_vm6, %v686_v32, %v1152_v51  ;;  %v217_v56 = vsel %vm201_vm2, %v178_v43, -inf  ;;  %v218_v58 = vsel %vm201_vm2, %v180_v48, -inf }
  0x42   : > { %1347 = vrot.lane.b32.xlu0 %v1331_v42, %s2730_s4  ;;  %v1154_v57 = vsel %vm1143_vm7, %v693_v49, %v1153_v55  ;;  %v334_v59 = vcombine.high %v216_v52, %v216_v52  ;;  %v341_v60 = vrot.slane %v216_v52, %v2842_v9  ;;  %v707_v61 = vmax.f32 %v705_v45, %v706_v53 }
  0x43   : > { %v714_v37 = vmax.f32 %v712_v46, %v713_v54  ;;  %v1155_v62 = vsel %vm1145_vm8, %v700_v50, %v1154_v57  ;;  %v219_v63 = vmax.f32 %v217_v56, %v218_v58  ;;  %v220_v3 = vsel %vm201_vm2, %v181_v33, -inf  ;;  %v182_v58 = vld [vmem:[%s2837_s28 + $0x68] sm:$0xff] }
  0x44   : > { %v348_v0 = vrot.slane %v334_v59, %v2842_v9  ;;  %v349_v1 = vcombine.high %v341_v60, %v341_v60  ;;  %v715_v2 = vsel %vm602_vm3, %v341_v60, -inf  ;;  %v1156_v4 = vsel %vm1147_vm9, %v707_v61, %v1155_v62 }
  0x45   : > { %v351_v5 = vcombine.high %v219_v63, %v219_v63  ;;  %v358_v6 = vrot.slane %v219_v63, %v2842_v9  ;;  %v716_v7 = vrot.slane %v715_v2, 4  ;;  %v1157_v10 = vsel %vm1149_vm10, %v714_v37, %v1156_v4  ;;  %v184_v37 = vld [vmem:[%s2837_s28 + $0x78] sm:$0xff]  ;;  %v2953_v4 = vld [vmem:[#allocation2] sm:$0xff] }
  0x46   : > { %1396 = vrot.lane.b32.xlu0 %v1234_v27, %s2731_s5  ;;  %v350_v11 = vcombine.high %v348_v0, %v348_v0  ;;  %v722_v12 = vsel %vm602_vm3, %v349_v1, -inf  ;;  %v729_v13 = vsel %vm602_vm3, %v348_v0, -inf  ;;  %1210 = vst.msk [vmem:[#allocation2 + $0x21] sm:$0xff] %vm201_vm2, %v1157_v10  ;;  %v221_v21 = vsel %vm201_vm2, %v183_v8, -inf  ;;  %1225 = vst.msk [vmem:[#allocation3] sm:$0xff] %vm201_vm2, %v2953_v4 }
  0x47   : > { %v365_v14 = vrot.slane %v351_v5, %v2842_v9  ;;  %v366_v15 = vcombine.high %v358_v6, %v358_v6  ;;  %v717_v16 = vmax.f32 %v715_v2, %v716_v7  ;;  %v723_v17 = vrot.slane %v722_v12, 4  ;;  %v1218_v5 = vld [vmem:[#allocation2 + $0x10] sm:$0xff] }
  0x48   : > { %v730_v18 = vrot.slane %v729_v13, 4  ;;  %v736_v19 = vsel %vm602_vm3, %v350_v11, -inf  ;;  %v743_v20 = vsel %vm602_vm3, %v358_v6, -inf  ;;  %v222_v62 = vmax.f32 %v220_v3, %v221_v21  ;;  %1226 = vst.msk [vmem:[#allocation3 + $0x8] sm:$0xff] %vm201_vm2, %v1218_v5 }
  0x49   : > { %v367_v22 = vcombine.high %v365_v14, %v365_v14  ;;  %v718_v23 = vrot.slane %v717_v16, 2  ;;  %v724_v24 = vmax.f32 %v722_v12, %v723_v17  ;;  %v737_v25 = vrot.slane %v736_v19, 4 }
  0x4a   : > { %v731_v27 = vmax.f32 %v729_v13, %v730_v18  ;;  %v744_v28 = vrot.slane %v743_v20, 4  ;;  %v750_v29 = vsel %vm602_vm3, %v366_v15, -inf  ;;  %v757_v30 = vsel %vm602_vm3, %v365_v14, -inf  ;;  %v185_v15 = vld [vmem:[%s2837_s28 + $0x80] sm:$0xff] }
  0x4b   : > { %v719_v31 = vmax.f32 %v717_v16, %v718_v23  ;;  %v725_v34 = vrot.slane %v724_v24, 2  ;;  %v738_v35 = vmax.f32 %v736_v19, %v737_v25  ;;  %v751_v36 = vrot.slane %v750_v29, 4 }
  0x4c   : > { %v732_v38 = vrot.slane %v731_v27, 2  ;;  %v745_v39 = vmax.f32 %v743_v20, %v744_v28  ;;  %v758_v40 = vrot.slane %v757_v30, 4  ;;  %v764_v41 = vsel %vm602_vm3, %v367_v22, -inf }
  0x4d   : > { %v720_v42 = vrot.slane %v719_v31, 1  ;;  %v726_v43 = vmax.f32 %v724_v24, %v725_v34  ;;  %v739_v44 = vrot.slane %v738_v35, 2  ;;  %v752_v32 = vmax.f32 %v750_v29, %v751_v36  ;;  %v2943_v45 = vld [vmem:[#allocation2 + $0x20] sm:$0xff] }
  0x4e   : > { %v2945_v46 = vld [vmem:[#allocation2 + $0x21] sm:$0xff]  ;;  %v733_v47 = vmax.f32 %v731_v27, %v732_v38  ;;  %v746_v48 = vrot.slane %v745_v39, 2  ;;  %v759_v49 = vmax.f32 %v757_v30, %v758_v40  ;;  %v765_v50 = vrot.slane %v764_v41, 4  ;;  %1349 = vrot.lane.b32.xlu1 %v2943_v45, %s2730_s4 }
  0x4f   : > { %1398 = vrot.lane.b32.xlu0 %v2945_v46, %s2731_s5  ;;  %v721_v51 = vmax.f32 %v719_v31, %v720_v42  ;;  %v727_v52 = vrot.slane %v726_v43, 1  ;;  %v740_v53 = vmax.f32 %v738_v35, %v739_v44  ;;  %v753_v54 = vrot.slane %v752_v32, 2  ;;  %v1219_v6 = vld [vmem:[#allocation2 + $0x20] sm:$0xff] }
  0x50   : > { %v734_v55 = vrot.slane %v733_v47, 1  ;;  %v747_v56 = vmax.f32 %v745_v39, %v746_v48  ;;  %v760_v33 = vrot.slane %v759_v49, 2  ;;  %v766_v57 = vmax.f32 %v764_v41, %v765_v50  ;;  %1227 = vst.msk [vmem:[#allocation3 + $0x10] sm:$0xff] %vm201_vm2, %v1219_v6  ;;  %v2976_v29 = vld [vmem:[#allocation2 + $0x22] sm:$0xff] }
  0x51   : > { %v728_v59 = vmax.f32 %v726_v43, %v727_v52  ;;  %v741_v60 = vrot.slane %v740_v53, 1  ;;  %v754_v61 = vmax.f32 %v752_v32, %v753_v54  ;;  %v223_v11 = vsel %vm201_vm2, %v182_v58, -inf }
  0x52   : > { %v735_v63 = vmax.f32 %v733_v47, %v734_v55  ;;  %v748_v0 = vrot.slane %v747_v56, 1  ;;  %v761_v1 = vmax.f32 %v759_v49, %v760_v33  ;;  %v767_v2 = vrot.slane %v766_v57, 2  ;;  %1253 = vrot.lane.b32.xlu1 %v2945_v46, %s2728_s29 }
  0x53   : > { %v742_v7 = vmax.f32 %v740_v53, %v741_v60  ;;  %v755_v8 = vrot.slane %v754_v61, 1  ;;  %v1158_v10 = vsel %vm1137_vm4, %v728_v59, %v721_v51  ;;  %v224_v18 = vsel %vm201_vm2, %v184_v37, -inf }
  0x54   : > { %v749_v3 = vmax.f32 %v747_v56, %v748_v0  ;;  %v762_v12 = vrot.slane %v761_v1, 1  ;;  %v768_v13 = vmax.f32 %v766_v57, %v767_v2  ;;  %v1159_v14 = vsel %vm1139_vm5, %v735_v63, %v1158_v10 }
  0x55   : > { %v756_v16 = vmax.f32 %v754_v61, %v755_v8  ;;  %v1160_v17 = vsel %vm1141_vm6, %v742_v7, %v1159_v14  ;;  %v368_v19 = vcombine.high %v222_v62, %v222_v62  ;;  %v225_v23 = vmax.f32 %v223_v11, %v224_v18  ;;  %v187_v18 = vld [vmem:[%s2837_s28 + $0x90] sm:$0xff] }
  0x56   : > { %v763_v20 = vmax.f32 %v761_v1, %v762_v12  ;;  %v769_v21 = vrot.slane %v768_v13, 1  ;;  %v1161_v22 = vsel %vm1143_vm7, %v749_v3, %v1160_v17  ;;  %1445 = vrot.lane.b32.xlu1 %v2906_v26, %s2732_s6  ;;  %v375_v25 = vrot.slane %v222_v62, %v2842_v9 }
  0x57   : > { %v1162_v24 = vsel %vm1145_vm8, %v756_v16, %v1161_v22  ;;  %v382_v27 = vrot.slane %v368_v19, %v2842_v9  ;;  %v2974_v28 = vsel %vm201_vm2, %v185_v15, -inf  ;;  %v385_v34 = vcombine.high %v225_v23, %v225_v23 }
  0x58   : > { %v770_v30 = vmax.f32 %v768_v13, %v769_v21  ;;  %v1163_v31 = vsel %vm1147_vm9, %v763_v20, %v1162_v24  ;;  %v392_v35 = vrot.slane %v225_v23, %v2842_v9  ;;  %v383_v36 = vcombine.high %v375_v25, %v375_v25 }
  0x59   : > { %v384_v38 = vcombine.high %v382_v27, %v382_v27  ;;  %v771_v26 = vsel %vm602_vm3, %v375_v25, -inf  ;;  %v785_v39 = vsel %vm602_vm3, %v382_v27, -inf  ;;  %v399_v41 = vrot.slane %v385_v34, %v2842_v9  ;;  %v188_v34 = vld [vmem:[%s2837_s28 + $0x98] sm:$0xff] }
  0x5a   : > { %v1164_v40 = vsel %vm1149_vm10, %v770_v30, %v1163_v31  ;;  %v400_v42 = vcombine.high %v392_v35, %v392_v35  ;;  %v772_v43 = vrot.slane %v771_v26, 4  ;;  %1302 = vrot.lane.b32.xlu1 %v2976_v29, %s2729_s30  ;;  %v778_v44 = vsel %vm602_vm3, %v383_v36, -inf  ;;  %v186_v31 = vld [vmem:[%s2837_s28 + $0x88] sm:$0xff] }
  0x5b   : > { %1211 = vst.msk [vmem:[#allocation2 + $0x31] sm:$0xff] %vm201_vm2, %v1164_v40  ;;  %v786_v32 = vrot.slane %v785_v39, 4  ;;  %v792_v47 = vsel %vm602_vm3, %v384_v38, -inf  ;;  %v799_v48 = vsel %vm602_vm3, %v392_v35, -inf  ;;  %v401_v49 = vcombine.high %v399_v41, %v399_v41 }
  0x5c   : > { %v773_v50 = vmax.f32 %v771_v26, %v772_v43  ;;  %v779_v51 = vrot.slane %v778_v44, 4  ;;  %v793_v52 = vrot.slane %v792_v47, 4  ;;  %v800_v54 = vrot.slane %v799_v48, 4  ;;  %v189_v43 = vld [vmem:[%s2837_s28 + $0xa0] sm:$0xff] }
  0x5d   : > { %v787_v53 = vmax.f32 %v785_v39, %v786_v32  ;;  %v806_v55 = vsel %vm602_vm3, %v400_v42, -inf  ;;  %v813_v56 = vsel %vm602_vm3, %v399_v41, -inf  ;;  %v820_v62 = vsel %vm602_vm3, %v401_v49, -inf }
  0x5e   : > { %v774_v33 = vrot.slane %v773_v50, 2  ;;  %v780_v57 = vmax.f32 %v778_v44, %v779_v51  ;;  %v794_v58 = vmax.f32 %v792_v47, %v793_v52  ;;  %v807_v59 = vrot.slane %v806_v55, 4  ;;  %1495 = vrot.lane.b32.xlu1 %v2943_v45, %s2733_s7 }
  0x5f   : > { %v788_v60 = vrot.slane %v787_v53, 2  ;;  %v801_v61 = vmax.f32 %v799_v48, %v800_v54  ;;  %v814_v37 = vrot.slane %v813_v56, 4  ;;  %v821_v8 = vrot.slane %v820_v62, 4 }
  0x60   : > { %v775_v63 = vmax.f32 %v773_v50, %v774_v33  ;;  %v781_v0 = vrot.slane %v780_v57, 2  ;;  %v795_v1 = vrot.slane %v794_v58, 2  ;;  %v808_v2 = vmax.f32 %v806_v55, %v807_v59  ;;  %v191_v50 = vld [vmem:[%s2837_s28 + $0xb0] sm:$0xff] }
  0x61   : > { %v789_v5 = vmax.f32 %v787_v53, %v788_v60  ;;  %v802_v6 = vrot.slane %v801_v61, 2  ;;  %v815_v7 = vmax.f32 %v813_v56, %v814_v37  ;;  %v822_v17 = vmax.f32 %v820_v62, %v821_v8 }
  0x62   : > { %v2995_v10 = vld [vmem:[#allocation2 + $0x31] sm:$0xff]  ;;  %v776_v3 = vrot.slane %v775_v63, 1  ;;  %v782_v45 = vmax.f32 %v780_v57, %v781_v0  ;;  %v796_v12 = vmax.f32 %v794_v58, %v795_v1  ;;  %v809_v13 = vrot.slane %v808_v2, 2 }
  0x63   : > { %v2997_v11 = vld [vmem:[#allocation2 + $0x30] sm:$0xff]  ;;  %1255 = vrot.lane.b32.xlu0 %v2995_v10, %s2728_s29  ;;  %v790_v14 = vrot.slane %v789_v5, 1  ;;  %v803_v15 = vmax.f32 %v801_v61, %v802_v6  ;;  %v816_v16 = vrot.slane %v815_v7, 2  ;;  %v823_v30 = vrot.slane %v822_v17, 2 }
  0x64   : > { %1351 = vrot.lane.b32.xlu1 %v2997_v11, %s2730_s4  ;;  %v1220_v19 = vld [vmem:[#allocation2 + $0x30] sm:$0xff]  ;;  %v777_v20 = vmax.f32 %v775_v63, %v776_v3  ;;  %v783_v21 = vrot.slane %v782_v45, 1  ;;  %v797_v22 = vrot.slane %v796_v12, 1  ;;  %v810_v23 = vmax.f32 %v808_v2, %v809_v13 }
  0x65   : > { %1228 = vst.msk [vmem:[#allocation3 + $0x18] sm:$0xff] %vm201_vm2, %v1220_v19  ;;  %v791_v24 = vmax.f32 %v789_v5, %v790_v14  ;;  %v804_v25 = vrot.slane %v803_v15, 1  ;;  %v817_v27 = vmax.f32 %v815_v7, %v816_v16  ;;  %v227_v26 = vsel %vm201_vm2, %v187_v18, -inf  ;;  %v3014_v44 = vld [vmem:[#allocation2 + $0x32] sm:$0xff] }
  0x66   : > { %v784_v35 = vmax.f32 %v782_v45, %v783_v21  ;;  %v798_v36 = vmax.f32 %v796_v12, %v797_v22  ;;  %v811_v38 = vrot.slane %v810_v23, 1  ;;  %v824_v41 = vmax.f32 %v822_v17, %v823_v30 }
  0x67   : > { %1447 = vrot.lane.b32.xlu0 %v2976_v29, %s2732_s6  ;;  %v805_v39 = vmax.f32 %v803_v15, %v804_v25  ;;  %v818_v40 = vrot.slane %v817_v27, 1  ;;  %v228_v42 = vmax.f32 %v2974_v28, %v227_v26  ;;  %v229_v48 = vsel %vm201_vm2, %v186_v31, -inf }
  0x68   : > { %1544 = vrot.lane.b32.xlu1 %v2945_v46, %s2734_s8  ;;  %v812_v32 = vmax.f32 %v810_v23, %v811_v38  ;;  %v1165_v47 = vsel %vm1137_vm4, %v784_v35, %v777_v20  ;;  %v230_v49 = vsel %vm201_vm2, %v188_v34, -inf  ;;  %v825_v52 = vrot.slane %v824_v41, 1 }
  0x69   : > { %v819_v51 = vmax.f32 %v817_v27, %v818_v40  ;;  %v1166_v46 = vsel %vm1139_vm5, %v791_v24, %v1165_v47  ;;  %v231_v53 = vmax.f32 %v229_v48, %v230_v49  ;;  %v402_v55 = vcombine.high %v228_v42, %v228_v42 }
  0x6a   : > { %v1167_v54 = vsel %vm1141_vm6, %v798_v36, %v1166_v46  ;;  %v409_v28 = vrot.slane %v228_v42, %v2842_v9  ;;  %v232_v56 = vsel %vm201_vm2, %v189_v43, -inf  ;;  %v826_v33 = vmax.f32 %v824_v41, %v825_v52  ;;  %v190_v46 = vld [vmem:[%s2837_s28 + $0xa8] sm:$0xff] }
  0x6b   : > { %1304 = vrot.lane.b32.xlu0 %v3014_v44, %s2729_s30  ;;  %v1168_v57 = vsel %vm1143_vm7, %v805_v39, %v1167_v54  ;;  %v419_v58 = vcombine.high %v231_v53, %v231_v53  ;;  %v233_v59 = vsel %vm201_vm2, %v191_v50, -inf  ;;  %v416_v61 = vrot.slane %v402_v55, %v2842_v9 }
  0x6c   : > { %1400 = vrot.lane.b32.xlu1 %v2995_v10, %s2731_s5  ;;  %v1169_v60 = vsel %vm1145_vm8, %v812_v32, %v1168_v57  ;;  %v417_v37 = vcombine.high %v409_v28, %v409_v28  ;;  %v426_v62 = vrot.slane %v231_v53, %v2842_v9  ;;  %v827_v1 = vsel %vm602_vm3, %v409_v28, -inf }
  0x6d   : > { %v1170_v63 = vsel %vm1147_vm9, %v819_v51, %v1169_v60  ;;  %v433_v0 = vrot.slane %v419_v58, %v2842_v9  ;;  %v3036_v2 = vmax.f32 %v232_v56, %v233_v59  ;;  %v418_v6 = vcombine.high %v416_v61, %v416_v61  ;;  %v192_v59 = vld [vmem:[%s2837_s28 + $0xb8] sm:$0xff] }
  0x6e   : > { %v1171_v5 = vsel %vm1149_vm10, %v826_v33, %v1170_v63  ;;  %v434_v7 = vcombine.high %v426_v62, %v426_v62  ;;  %v828_v8 = vrot.slane %v827_v1, 4  ;;  %v834_v45 = vsel %vm602_vm3, %v417_v37, -inf }
  0x6f   : > { %1497 = vrot.lane.b32.xlu0 %v2997_v11, %s2733_s7  ;;  %1212 = vst.msk [vmem:[#allocation2 + $0x41] sm:$0xff] %vm201_vm2, %v1171_v5  ;;  %v435_v3 = vcombine.high %v433_v0, %v433_v0  ;;  %v841_v12 = vsel %vm602_vm3, %v416_v61, -inf  ;;  %v855_v13 = vsel %vm602_vm3, %v426_v62, -inf  ;;  %v835_v15 = vrot.slane %v834_v45, 4 }
  0x70   : > { %1593 = vrot.lane.b32.xlu1 %v2976_v29, %s2735_s9  ;;  %v829_v14 = vmax.f32 %v827_v1, %v828_v8  ;;  %v842_v16 = vrot.slane %v841_v12, 4  ;;  %v848_v17 = vsel %vm602_vm3, %v418_v6, -inf  ;;  %v856_v11 = vrot.slane %v855_v13, 4  ;;  %v193_v6 = vld [vmem:[%s2837_s28 + $0xc0] sm:$0xff] }
  0x71   : > { %v849_v18 = vrot.slane %v848_v17, 4  ;;  %v862_v19 = vsel %vm602_vm3, %v434_v7, -inf  ;;  %v869_v20 = vsel %vm602_vm3, %v433_v0, -inf  ;;  %v836_v29 = vmax.f32 %v834_v45, %v835_v15 }
  0x72   : > { %v830_v21 = vrot.slane %v829_v14, 2  ;;  %v843_v22 = vmax.f32 %v841_v12, %v842_v16  ;;  %v863_v23 = vrot.slane %v862_v19, 4  ;;  %v857_v25 = vmax.f32 %v855_v13, %v856_v11  ;;  %v195_v13 = vld [vmem:[%s2837_s28 + $0xd0] sm:$0xff] }
  0x73   : > { %v850_v24 = vmax.f32 %v848_v17, %v849_v18  ;;  %v870_v27 = vrot.slane %v869_v20, 4  ;;  %v876_v30 = vsel %vm602_vm3, %v435_v3, -inf  ;;  %v837_v34 = vrot.slane %v836_v29, 2 }
  0x74   : > { %v831_v31 = vmax.f32 %v829_v14, %v830_v21  ;;  %v844_v35 = vrot.slane %v843_v22, 2  ;;  %v864_v36 = vmax.f32 %v862_v19, %v863_v23  ;;  %v858_v26 = vrot.slane %v857_v25, 2 }
  0x75   : > { %v851_v38 = vrot.slane %v850_v24, 2  ;;  %v871_v39 = vmax.f32 %v869_v20, %v870_v27  ;;  %v877_v40 = vrot.slane %v876_v30, 4  ;;  %v838_v32 = vmax.f32 %v836_v29, %v837_v34 }
  0x76   : > { %v3051_v41 = vld [vmem:[#allocation2 + $0x40] sm:$0xff]  ;;  %v832_v43 = vrot.slane %v831_v31, 1  ;;  %v845_v47 = vmax.f32 %v843_v22, %v844_v35  ;;  %v865_v48 = vrot.slane %v864_v36, 2  ;;  %v859_v50 = vmax.f32 %v857_v25, %v858_v26 }
  0x77   : > { %v3053_v42 = vld [vmem:[#allocation2 + $0x41] sm:$0xff]  ;;  %1353 = vrot.lane.b32.xlu0 %v3051_v41, %s2730_s4  ;;  %v852_v49 = vmax.f32 %v850_v24, %v851_v38  ;;  %v872_v51 = vrot.slane %v871_v39, 2  ;;  %v878_v52 = vmax.f32 %v876_v30, %v877_v40  ;;  %1229 = vst.msk [vmem:[#allocation3 + $0x20] sm:$0xff] %vm201_vm2, %v3051_v41  ;;  %v839_v54 = vrot.slane %v838_v32, 1 }
  0x78   : > { %1402 = vrot.lane.b32.xlu1 %v3053_v42, %s2731_s5  ;;  %v833_v53 = vmax.f32 %v831_v31, %v832_v43  ;;  %v846_v55 = vrot.slane %v845_v47, 1  ;;  %v866_v28 = vmax.f32 %v864_v36, %v865_v48  ;;  %v860_v33 = vrot.slane %v859_v50, 1  ;;  %v3069_v7 = vld [vmem:[#allocation2 + $0x42] sm:$0xff] }
  0x79   : > { %v853_v56 = vrot.slane %v852_v49, 1  ;;  %v873_v57 = vmax.f32 %v871_v39, %v872_v51  ;;  %v879_v58 = vrot.slane %v878_v52, 2  ;;  %v840_v60 = vmax.f32 %v838_v32, %v839_v54 }
  0x7a   : > { %v847_v61 = vmax.f32 %v845_v47, %v846_v55  ;;  %v867_v37 = vrot.slane %v866_v28, 1  ;;  %v235_v62 = vsel %vm201_vm2, %v190_v46, -inf  ;;  %v861_v0 = vmax.f32 %v859_v50, %v860_v33 }
  0x7b   : > { %1546 = vrot.lane.b32.xlu0 %v2995_v10, %s2734_s8  ;;  %v854_v63 = vmax.f32 %v852_v49, %v853_v56  ;;  %v874_v1 = vrot.slane %v873_v57, 1  ;;  %v880_v5 = vmax.f32 %v878_v52, %v879_v58  ;;  %v1172_v3 = vsel %vm1137_vm4, %v840_v60, %v833_v53 }
  0x7c   : > { %1595 = vrot.lane.b32.xlu1 %v3014_v44, %s2735_s9  ;;  %v868_v8 = vmax.f32 %v866_v28, %v867_v37  ;;  %v236_v45 = vsel %vm201_vm2, %v192_v59, -inf  ;;  %v436_v12 = vcombine.high %v3036_v2, %v3036_v2  ;;  %v1173_v15 = vsel %vm1139_vm5, %v847_v61, %v1172_v3 }
  0x7d   : > { %v875_v10 = vmax.f32 %v873_v57, %v874_v1  ;;  %v881_v14 = vrot.slane %v880_v5, 1  ;;  %v237_v16 = vmax.f32 %v235_v62, %v236_v45  ;;  %v1174_v17 = vsel %vm1141_vm6, %v854_v63, %v1173_v15 }
  0x7e   : > { %v443_v18 = vrot.slane %v3036_v2, %v2842_v9  ;;  %v450_v11 = vrot.slane %v436_v12, %v2842_v9  ;;  %v3082_v19 = vsel %vm201_vm2, %v193_v6, -inf  ;;  %v1175_v21 = vsel %vm1143_vm7, %v861_v0, %v1174_v17 }
  0x7f   : > { %1257 = vrot.lane.b32.xlu0 %v3053_v42, %s2728_s29  ;;  %v882_v20 = vmax.f32 %v880_v5, %v881_v14  ;;  %v453_v29 = vcombine.high %v237_v16, %v237_v16  ;;  %v3090_v22 = vsel %vm201_vm2, %v195_v13, -inf  ;;  %v1176_v2 = vsel %vm1145_vm8, %v868_v8, %v1175_v21 }
  0x80   : > { %1306 = vrot.lane.b32.xlu1 %v3069_v7, %s2729_s30  ;;  %v451_v23 = vcombine.high %v443_v18, %v443_v18  ;;  %v452_v24 = vcombine.high %v450_v11, %v450_v11  ;;  %v460_v25 = vrot.slane %v237_v16, %v2842_v9  ;;  %v1177_v27 = vsel %vm1147_vm9, %v875_v10, %v1176_v2 }
  0x81   : > { %v467_v30 = vrot.slane %v453_v29, %v2842_v9  ;;  %v883_v31 = vsel %vm602_vm3, %v443_v18, -inf  ;;  %v897_v34 = vsel %vm602_vm3, %v450_v11, -inf  ;;  %v1178_v35 = vsel %vm1149_vm10, %v882_v20, %v1177_v27  ;;  %v194_v11 = vld [vmem:[%s2837_s28 + $0xc8] sm:$0xff] }
  0x82   : > { %v468_v36 = vcombine.high %v460_v25, %v460_v25  ;;  %v884_v38 = vrot.slane %v883_v31, 4  ;;  %v890_v26 = vsel %vm602_vm3, %v451_v23, -inf  ;;  %1213 = vst.msk [vmem:[#allocation2 + $0x51] sm:$0xff] %vm201_vm2, %v1178_v35  ;;  %v898_v43 = vrot.slane %v897_v34, 4  ;;  %v196_v23 = vld [vmem:[%s2837_s28 + $0xd8] sm:$0xff] }
  0x83   : > { %1449 = vrot.lane.b32.xlu0 %v3014_v44, %s2732_s6  ;;  %v469_v39 = vcombine.high %v467_v30, %v467_v30  ;;  %v891_v40 = vrot.slane %v890_v26, 4  ;;  %v904_v32 = vsel %vm602_vm3, %v452_v24, -inf  ;;  %v911_v49 = vsel %vm602_vm3, %v460_v25, -inf }
  0x84   : > { %1499 = vrot.lane.b32.xlu1 %v3051_v41, %s2733_s7  ;;  %v885_v47 = vmax.f32 %v883_v31, %v884_v38  ;;  %v905_v48 = vrot.slane %v904_v32, 4  ;;  %v918_v50 = vsel %vm602_vm3, %v468_v36, -inf  ;;  %v899_v52 = vmax.f32 %v897_v34, %v898_v43  ;;  %v197_v38 = vld [vmem:[%s2837_s28 + $0xe0] sm:$0xff] }
  0x85   : > { %v892_v51 = vmax.f32 %v890_v26, %v891_v40  ;;  %v912_v46 = vrot.slane %v911_v49, 4  ;;  %v919_v44 = vrot.slane %v918_v50, 4  ;;  %v925_v55 = vsel %vm602_vm3, %v467_v30, -inf }
  0x86   : > { %v886_v53 = vrot.slane %v885_v47, 2  ;;  %v906_v54 = vmax.f32 %v904_v32, %v905_v48  ;;  %v932_v41 = vsel %vm602_vm3, %v469_v39, -inf  ;;  %v900_v56 = vrot.slane %v899_v52, 2 }
  0x87   : > { %v893_v28 = vrot.slane %v892_v51, 2  ;;  %v913_v33 = vmax.f32 %v911_v49, %v912_v46  ;;  %v920_v57 = vmax.f32 %v918_v50, %v919_v44  ;;  %v926_v60 = vrot.slane %v925_v55, 4 }
  0x88   : > { %v887_v58 = vmax.f32 %v885_v47, %v886_v53  ;;  %v907_v59 = vrot.slane %v906_v54, 2  ;;  %v933_v61 = vrot.slane %v932_v41, 4  ;;  %v901_v62 = vmax.f32 %v899_v52, %v900_v56  ;;  %v199_v56 = vld [vmem:[%s2837_s28 + $0xf0] sm:$0xff] }
  0x89   : > { %v894_v37 = vmax.f32 %v892_v51, %v893_v28  ;;  %v914_v63 = vrot.slane %v913_v33, 2  ;;  %v921_v0 = vrot.slane %v920_v57, 2  ;;  %v3110_v1 = vld [vmem:[#allocation2 + $0x51] sm:$0xff]  ;;  %v927_v3 = vmax.f32 %v925_v55, %v926_v60 }
  0x8a   : > { %v3112_v5 = vld [vmem:[#allocation2 + $0x50] sm:$0xff]  ;;  %v888_v6 = vrot.slane %v887_v58, 1  ;;  %v908_v8 = vmax.f32 %v906_v54, %v907_v59  ;;  %v934_v45 = vmax.f32 %v932_v41, %v933_v61  ;;  %1259 = vrot.lane.b32.xlu0 %v3110_v1, %s2728_s29  ;;  %v902_v13 = vrot.slane %v901_v62, 1 }
  0x8b   : > { %1355 = vrot.lane.b32.xlu1 %v3112_v5, %s2730_s4  ;;  %v895_v12 = vrot.slane %v894_v37, 1  ;;  %v915_v10 = vmax.f32 %v913_v33, %v914_v63  ;;  %v922_v14 = vmax.f32 %v920_v57, %v921_v0  ;;  %1230 = vst.msk [vmem:[#allocation3 + $0x28] sm:$0xff] %vm201_vm2, %v3112_v5  ;;  %v928_v17 = vrot.slane %v927_v3, 2  ;;  %v3131_v26 = vld [vmem:[#allocation2 + $0x52] sm:$0xff] }
  0x8c   : > { %v889_v15 = vmax.f32 %v887_v58, %v888_v6  ;;  %v909_v16 = vrot.slane %v908_v8, 1  ;;  %v935_v18 = vrot.slane %v934_v45, 2  ;;  %v903_v21 = vmax.f32 %v901_v62, %v902_v13 }
  0x8d   : > { %v896_v20 = vmax.f32 %v894_v37, %v895_v12  ;;  %v916_v29 = vrot.slane %v915_v10, 1  ;;  %v923_v2 = vrot.slane %v922_v14, 1  ;;  %v929_v25 = vmax.f32 %v927_v3, %v928_v17 }
  0x8e   : > { %v910_v24 = vmax.f32 %v908_v8, %v909_v16  ;;  %v936_v27 = vmax.f32 %v934_v45, %v935_v18  ;;  %v240_v30 = vmax.f32 %v3082_v19, %v3090_v22  ;;  %1451 = vrot.lane.b32.xlu0 %v3069_v7, %s2732_s6  ;;  %v241_v36 = vsel %vm201_vm2, %v194_v11, -inf }
  0x8f   : > { %1548 = vrot.lane.b32.xlu1 %v3053_v42, %s2734_s8  ;;  %v917_v31 = vmax.f32 %v915_v10, %v916_v29  ;;  %v924_v34 = vmax.f32 %v922_v14, %v923_v2  ;;  %v1179_v35 = vsel %vm1137_vm4, %v896_v20, %v889_v15  ;;  %v930_v39 = vrot.slane %v929_v25, 1 }
  0x90   : > { %v937_v40 = vrot.slane %v936_v27, 1  ;;  %v1180_v43 = vsel %vm1139_vm5, %v903_v21, %v1179_v35  ;;  %v242_v19 = vsel %vm201_vm2, %v196_v23, -inf  ;;  %v470_v47 = vcombine.high %v240_v30, %v240_v30 }
  0x91   : > { %v1181_v22 = vsel %vm1141_vm6, %v910_v24, %v1180_v43  ;;  %v243_v32 = vmax.f32 %v241_v36, %v242_v19  ;;  %v477_v42 = vrot.slane %v240_v30, %v2842_v9  ;;  %v931_v48 = vmax.f32 %v929_v25, %v930_v39 }
  0x92   : > { %v938_v49 = vmax.f32 %v936_v27, %v937_v40  ;;  %v1182_v50 = vsel %vm1143_vm7, %v917_v31, %v1181_v22  ;;  %v3139_v51 = vsel %vm201_vm2, %v197_v38, -inf  ;;  %1308 = vrot.lane.b32.xlu0 %v3131_v26, %s2729_s30  ;;  %v484_v46 = vrot.slane %v470_v47, %v2842_v9 }
  0x93   : > { %1404 = vrot.lane.b32.xlu1 %v3110_v1, %s2731_s5  ;;  %v1183_v52 = vsel %vm1145_vm8, %v924_v34, %v1182_v50  ;;  %v485_v44 = vcombine.high %v477_v42, %v477_v42  ;;  %v939_v53 = vsel %vm602_vm3, %v477_v42, -inf  ;;  %v487_v55 = vcombine.high %v243_v32, %v243_v32  ;;  %v198_v42 = vld [vmem:[%s2837_s28 + $0xe8] sm:$0xff] }
  0x94   : > { %v1184_v54 = vsel %vm1147_vm9, %v931_v48, %v1183_v52  ;;  %v494_v41 = vrot.slane %v243_v32, %v2842_v9  ;;  %v940_v28 = vrot.slane %v939_v53, 4  ;;  %v486_v57 = vcombine.high %v484_v46, %v484_v46 }
  0x95   : > { %v1185_v33 = vsel %vm1149_vm10, %v938_v49, %v1184_v54  ;;  %v946_v58 = vsel %vm602_vm3, %v485_v44, -inf  ;;  %v953_v59 = vsel %vm602_vm3, %v484_v46, -inf  ;;  %v501_v60 = vrot.slane %v487_v55, %v2842_v9  ;;  %v200_v55 = vld [vmem:[%s2837_s28 + $0xf8] sm:$0xff] }
  0x96   : > { %1214 = vst.msk [vmem:[#allocation2 + $0x61] sm:$0xff] %vm201_vm2, %v1185_v33  ;;  %v502_v61 = vcombine.high %v494_v41, %v494_v41  ;;  %v941_v37 = vmax.f32 %v939_v53, %v940_v28  ;;  %v947_v62 = vrot.slane %v946_v58, 4  ;;  %1501 = vrot.lane.b32.xlu0 %v3112_v5, %s2733_s7  ;;  %v954_v63 = vrot.slane %v953_v59, 4 }
  0x97   : > { %1597 = vrot.lane.b32.xlu1 %v3069_v7, %s2735_s9  ;;  %v960_v0 = vsel %vm602_vm3, %v486_v57, -inf  ;;  %v967_v6 = vsel %vm602_vm3, %v494_v41, -inf  ;;  %v245_v8 = vsel %vm201_vm2, %v199_v56, -inf  ;;  %v503_v3 = vcombine.high %v501_v60, %v501_v60 }
  0x98   : > { %v942_v45 = vrot.slane %v941_v37, 2  ;;  %v948_v12 = vmax.f32 %v946_v58, %v947_v62  ;;  %v961_v13 = vrot.slane %v960_v0, 4  ;;  %v955_v10 = vmax.f32 %v953_v59, %v954_v63  ;;  %v1250_v62 = vpop.permute.xlu0 %1249 }
  0x99   : > { %v968_v14 = vrot.slane %v967_v6, 4  ;;  %v974_v15 = vsel %vm602_vm3, %v502_v61, -inf  ;;  %v981_v5 = vsel %vm602_vm3, %v501_v60, -inf  ;;  %v988_v29 = vsel %vm602_vm3, %v503_v3, -inf  ;;  %1274 = vst.msk [vmem:[#allocation3] sm:$0xff] %vm1273_vm11, %v1250_v62 }
  0x9a   : > { %v943_v16 = vmax.f32 %v941_v37, %v942_v45  ;;  %v949_v17 = vrot.slane %v948_v12, 2  ;;  %v962_v7 = vmax.f32 %v960_v0, %v961_v13  ;;  %v975_v18 = vrot.slane %v974_v15, 4 }
  0x9b   : > { %v956_v11 = vrot.slane %v955_v10, 2  ;;  %v969_v20 = vmax.f32 %v967_v6, %v968_v14  ;;  %v982_v21 = vrot.slane %v981_v5, 4  ;;  %v989_v36 = vrot.slane %v988_v29, 4 }
  0x9c   : > { %v944_v2 = vrot.slane %v943_v16, 1  ;;  %v950_v23 = vmax.f32 %v948_v12, %v949_v17  ;;  %v963_v24 = vrot.slane %v962_v7, 2  ;;  %v976_v25 = vmax.f32 %v974_v15, %v975_v18 }
  0x9d   : > { %v3166_v27 = vld [vmem:[#allocation2 + $0x60] sm:$0xff]  ;;  %v957_v31 = vmax.f32 %v955_v10, %v956_v11  ;;  %v970_v34 = vrot.slane %v969_v20, 2  ;;  %v983_v35 = vmax.f32 %v981_v5, %v982_v21  ;;  %v990_v47 = vmax.f32 %v988_v29, %v989_v36 }
  0x9e   : > { %v3168_v30 = vld [vmem:[#allocation2 + $0x61] sm:$0xff]  ;;  %1357 = vrot.lane.b32.xlu0 %v3166_v27, %s2730_s4  ;;  %v945_v38 = vmax.f32 %v943_v16, %v944_v2  ;;  %v951_v39 = vrot.slane %v950_v23, 1  ;;  %v964_v40 = vmax.f32 %v962_v7, %v963_v24  ;;  %v977_v43 = vrot.slane %v976_v25, 2  ;;  %1231 = vst.msk [vmem:[#allocation3 + $0x30] sm:$0xff] %vm201_vm2, %v3166_v27 }
  0x9f   : > { %1406 = vrot.lane.b32.xlu1 %v3168_v30, %s2731_s5  ;;  %v958_v19 = vrot.slane %v957_v31, 1  ;;  %v971_v22 = vmax.f32 %v969_v20, %v970_v34  ;;  %v984_v32 = vrot.slane %v983_v35, 2  ;;  %v246_v52 = vmax.f32 %v3139_v51, %v245_v8  ;;  %v3189_v8 = vld [vmem:[#allocation2 + $0x62] sm:$0xff] }
  0xa0   : > { %v952_v48 = vmax.f32 %v950_v23, %v951_v39  ;;  %v965_v49 = vrot.slane %v964_v40, 1  ;;  %v978_v50 = vmax.f32 %v976_v25, %v977_v43  ;;  %v991_v54 = vrot.slane %v990_v47, 2 }
  0xa1   : > { %v959_v46 = vmax.f32 %v957_v31, %v958_v19  ;;  %v972_v44 = vrot.slane %v971_v22, 1  ;;  %v985_v53 = vmax.f32 %v983_v35, %v984_v32  ;;  %v247_v33 = vsel %vm201_vm2, %v198_v42, -inf }
  0xa2   : > { %1550 = vrot.lane.b32.xlu0 %v3110_v1, %s2734_s8  ;;  %v966_v41 = vmax.f32 %v964_v40, %v965_v49  ;;  %v979_v28 = vrot.slane %v978_v50, 1  ;;  %v1186_v56 = vsel %vm1137_vm4, %v952_v48, %v945_v38  ;;  %v992_v51 = vmax.f32 %v990_v47, %v991_v54 }
  0xa3   : > { %1599 = vrot.lane.b32.xlu1 %v3131_v26, %s2735_s9  ;;  %v973_v57 = vmax.f32 %v971_v22, %v972_v44  ;;  %v986_v58 = vrot.slane %v985_v53, 1  ;;  %v1187_v59 = vsel %vm1139_vm5, %v959_v46, %v1186_v56  ;;  %v248_v37 = vsel %vm201_vm2, %v200_v55, -inf  ;;  %v1299_v22 = vpop.permute.xlu1 %1298 }
  0xa4   : > { %v980_v60 = vmax.f32 %v978_v50, %v979_v28  ;;  %v1188_v61 = vsel %vm1141_vm6, %v966_v41, %v1187_v59  ;;  %v504_v1 = vcombine.high %v246_v52, %v246_v52  ;;  %v993_v0 = vrot.slane %v992_v51, 1  ;;  %1323 = vst.msk [vmem:[#allocation3] sm:$0xff] %vm1322_vm12, %v1299_v22 }
  0xa5   : > { %v987_v63 = vmax.f32 %v985_v53, %v986_v58  ;;  %v1189_v6 = vsel %vm1143_vm7, %v973_v57, %v1188_v61  ;;  %v249_v3 = vmax.f32 %v247_v33, %v248_v37  ;;  %v511_v12 = vrot.slane %v246_v52, %v2842_v9 }
  0xa6   : > { %1261 = vrot.lane.b32.xlu0 %v3168_v30, %s2728_s29  ;;  %v1190_v45 = vsel %vm1145_vm8, %v980_v60, %v1189_v6  ;;  %v518_v13 = vrot.slane %v504_v1, %v2842_v9  ;;  %v994_v10 = vmax.f32 %v992_v51, %v993_v0 }
  0xa7   : > { %1310 = vrot.lane.b32.xlu1 %v3189_v8, %s2729_s30  ;;  %v1191_v14 = vsel %vm1147_vm9, %v987_v63, %v1190_v45  ;;  %v521_v15 = vcombine.high %v249_v3, %v249_v3  ;;  %v528_v5 = vrot.slane %v249_v3, %v2842_v9  ;;  %v519_v16 = vcombine.high %v511_v12, %v511_v12 }
  0xa8   : > { %v520_v17 = vcombine.high %v518_v13, %v518_v13  ;;  %v995_v7 = vsel %vm602_vm3, %v511_v12, -inf  ;;  %v1009_v18 = vsel %vm602_vm3, %v518_v13, -inf  ;;  %v1192_v11 = vsel %vm1149_vm10, %v994_v10, %v1191_v14 }
  0xa9   : > { %v535_v20 = vrot.slane %v521_v15, %v2842_v9  ;;  %v536_v21 = vcombine.high %v528_v5, %v528_v5  ;;  %v996_v29 = vrot.slane %v995_v7, 4  ;;  %1215 = vst.msk [vmem:[#allocation2 + $0x71] sm:$0xff] %vm201_vm2, %v1192_v11  ;;  %v1002_v2 = vsel %vm602_vm3, %v519_v16, -inf }
  0xaa   : > { %1453 = vrot.lane.b32.xlu0 %v3131_v26, %s2732_s6  ;;  %v1010_v23 = vrot.slane %v1009_v18, 4  ;;  %v1016_v24 = vsel %vm602_vm3, %v520_v17, -inf  ;;  %v1023_v25 = vsel %vm602_vm3, %v528_v5, -inf  ;;  %v1003_v9 = vrot.slane %v1002_v2, 4 }
  0xab   : > { %1503 = vrot.lane.b32.xlu1 %v3166_v27, %s2733_s7  ;;  %v537_v31 = vcombine.high %v535_v20, %v535_v20  ;;  %v997_v34 = vmax.f32 %v995_v7, %v996_v29  ;;  %v1017_v35 = vrot.slane %v1016_v24, 4  ;;  %v1024_v38 = vrot.slane %v1023_v25, 4  ;;  %v1643_v29 = vld [vmem:[%s3651_s1] sm:$0xff] }
  0xac   : > { %v1011_v36 = vmax.f32 %v1009_v18, %v1010_v23  ;;  %v1030_v26 = vsel %vm602_vm3, %v536_v21, -inf  ;;  %v1037_v39 = vsel %vm602_vm3, %v535_v20, -inf  ;;  %v1004_v43 = vmax.f32 %v1002_v2, %v1003_v9 }
  0xad   : > { %v998_v40 = vrot.slane %v997_v34, 2  ;;  %v1018_v27 = vmax.f32 %v1016_v24, %v1017_v35  ;;  %v1031_v19 = vrot.slane %v1030_v26, 4  ;;  %v1025_v47 = vmax.f32 %v1023_v25, %v1024_v38  ;;  %v1645_v25 = vld [vmem:[%s3651_s1 + $0x10] sm:$0xff] }
  0xae   : > { %v1012_v32 = vrot.slane %v1011_v36, 2  ;;  %v1038_v42 = vrot.slane %v1037_v39, 4  ;;  %v1044_v48 = vsel %vm602_vm3, %v537_v31, -inf  ;;  %v1005_v50 = vrot.slane %v1004_v43, 2  ;;  %v1646_v31 = vld [vmem:[%s3651_s1 + $0x18] sm:$0xff] }
  0xaf   : > { %v999_v49 = vmax.f32 %v997_v34, %v998_v40  ;;  %v1019_v52 = vrot.slane %v1018_v27, 2  ;;  %v1032_v46 = vmax.f32 %v1030_v26, %v1031_v19  ;;  %v1026_v54 = vrot.slane %v1025_v47, 2  ;;  %v1301_v6 = vpop.permute.xlu1 %1300 }
  0xb0   : > { %v1252_v44 = vpop.permute.xlu0 %1251  ;;  %v1013_v53 = vmax.f32 %v1011_v36, %v1012_v32  ;;  %v1039_v55 = vmax.f32 %v1037_v39, %v1038_v42  ;;  %v1045_v41 = vrot.slane %v1044_v48, 4  ;;  %v3217_v28 = vld [vmem:[#allocation2 + $0x71] sm:$0xff]  ;;  %v1006_v57 = vmax.f32 %v1004_v43, %v1005_v50  ;;  %v1647_v43 = vld [vmem:[%s3651_s1 + $0x20] sm:$0x1f] }
  0xb1   : > { %1275 = vst.msk [vmem:[#allocation3 + $0x8] sm:$0xff] %vm1273_vm11, %v1252_v44  ;;  %v1484_v56 = vld [vmem:[#allocation2 + $0x70] sm:$0xff]  ;;  %v1000_v33 = vrot.slane %v999_v49, 1  ;;  %v1020_v58 = vmax.f32 %v1018_v27, %v1019_v52  ;;  %v1033_v51 = vrot.slane %v1032_v46, 2  ;;  %1263 = vrot.lane.b32.xlu0 %v3217_v28, %s2728_s29  ;;  %v1027_v60 = vmax.f32 %v1025_v47, %v1026_v54  ;;  %s2737_s29 = smov 48  }
  0xb2   : > { %1359 = vrot.lane.b32.xlu1 %v1484_v56, %s2730_s4  ;;  %v1014_v59 = vrot.slane %v1013_v53, 1  ;;  %v1040_v61 = vrot.slane %v1039_v55, 2  ;;  %v1046_v37 = vmax.f32 %v1044_v48, %v1045_v41  ;;  %1232 = vst.msk [vmem:[#allocation3 + $0x38] sm:$0xff] %vm201_vm2, %v1484_v56  ;;  %v1007_v62 = vrot.slane %v1006_v57, 1  ;;  %v1289_v18 = vld [vmem:[#allocation2 + $0x72] sm:$0xff] }
  0xb3   : > { %v1001_v1 = vmax.f32 %v999_v49, %v1000_v33  ;;  %v1021_v63 = vrot.slane %v1020_v58, 1  ;;  %v1034_v0 = vmax.f32 %v1032_v46, %v1033_v51  ;;  %v1028_v12 = vrot.slane %v1027_v60, 1  ;;  %1324 = vst.msk [vmem:[#allocation3 + $0x8] sm:$0xff] %vm1322_vm12, %v1301_v6  ;;  %v3273_v49 = vld [vmem:[#allocation2 + $0x91] sm:$0xff] }
  0xb4   : > { %v1348_v3 = vpop.permute.xlu0 %1347  ;;  %v1015_v45 = vmax.f32 %v1013_v53, %v1014_v59  ;;  %v1041_v13 = vmax.f32 %v1039_v55, %v1040_v61  ;;  %v1047_v10 = vrot.slane %v1046_v37, 2  ;;  %v1008_v14 = vmax.f32 %v1006_v57, %v1007_v62  ;;  %v3279_v52 = vld [vmem:[#allocation2 + $0x92] sm:$0xff] }
  0xb5   : > { %v1022_v15 = vmax.f32 %v1020_v58, %v1021_v63  ;;  %v1035_v5 = vrot.slane %v1034_v0, 1  ;;  %1455 = vrot.lane.b32.xlu0 %v3189_v8, %s2732_s6  ;;  %v1029_v16 = vmax.f32 %v1027_v60, %v1028_v12  ;;  %1372 = vst.msk [vmem:[#allocation3] sm:$0xff] %vm1371_vm13, %v1348_v3  ;;  %v2580_v26 = vpack.c.bf16 %v1646_v31, %v1645_v25 }
  0xb6   : > { %v1042_v17 = vrot.slane %v1041_v13, 1  ;;  %v1048_v7 = vmax.f32 %v1046_v37, %v1047_v10  ;;  %1552 = vrot.lane.b32.xlu1 %v3168_v30, %s2734_s8  ;;  %v1193_v20 = vsel %vm1137_vm4, %v1008_v14, %v1001_v1  ;;  %v1644_v30 = vld [vmem:[%s3651_s1 + $0x8] sm:$0xff]  ;;  %vm1568_vm3 = vcmask 261344  }
  0xb7   : > { %v1036_v11 = vmax.f32 %v1034_v0, %v1035_v5  ;;  %v1194_v24 = vsel %vm1139_vm5, %v1015_v45, %v1193_v20  ;;  %v2576_v36 = vpack.c.bf16 %v1644_v30, %v1643_v29  ;;  %vm1617_vm4 = vcmask 294144  }
  0xb8   : > { %v1397_v21 = vpop.permute.xlu0 %1396  ;;  %v1043_v2 = vmax.f32 %v1041_v13, %v1042_v17  ;;  %v1049_v23 = vrot.slane %v1048_v7, 1  ;;  %v1195_v34 = vsel %vm1141_vm6, %v1022_v15, %v1194_v24  ;;  %vm1626_vm5 = vcmask 302368  }
  0xb9   : > { %1421 = vst.msk [vmem:[#allocation3] sm:$0xff] %vm1420_vm14, %v1397_v21  ;;  %1312 = vrot.lane.b32.xlu0 %v1289_v18, %s2729_s30  ;;  %v1196_v35 = vsel %vm1143_vm7, %v1029_v16, %v1195_v34  ;;  %2577 = vmatprep.subr.bf16.mxu0 %v2576_v36  ;;  %v2736_v57 = vmov 1.0   ;;  %vm1648_vm6 = vcmask 302080   ;;  %vm1854_vm7 = vcmask 130112  }
  0xba   : > { %v1050_v9 = vmax.f32 %v1048_v7, %v1049_v23  ;;  %1408 = vrot.lane.b32.xlu1 %v3217_v28, %s2731_s5  ;;  %v1197_v38 = vsel %vm1145_vm8, %v1036_v11, %v1196_v35  ;;  %2579 = vmatpush3.bf16.msra.mxu0 %v2576_v36  ;;  %vm1903_vm8 = vcmask 195712  }
  0xbb   : > { %v1198_v39 = vsel %vm1147_vm9, %v1043_v2, %v1197_v38  ;;  %2581 = vmatprep.subr.bf16.mxu0 %v2580_v26  ;;  %vm1952_vm9 = vcmask 261312  }
  0xbc   : > { %v1199_v40 = vsel %vm1149_vm10, %v1050_v9, %v1198_v39  ;;  %vm2001_vm10 = vcmask 326912  }
  0xbd   : > { %1505 = vrot.lane.b32.xlu0 %v1484_v56, %s2733_s7  ;;  %1216 = vst.msk [vmem:[#allocation2 + $0x81] sm:$0xff] %vm201_vm2, %v1199_v40  ;;  %vm1519_vm2 = vcmask 228544  }
  0xbe   : > { %1601 = vrot.lane.b32.xlu1 %v3189_v8, %s2735_s9  ;;  %2583 = vmatpush3.bf16.msra.mxu0 %v2580_v26  ;;  %v3266_v8 = vld [vmem:[#allocation2 + $0x90] sm:$0xff] }
  0xbf   : > { %2530 = vmatprep.subr.msk.mxu0 %vm1673_vm15, %v1647_v43 }
  0xc0   : > { %v1350_v27 = vpop.permute.xlu1 %1349 }
  0xc1   : > { %v1399_v19 = vpop.permute.xlu0 %1398  ;;  %1373 = vst.msk [vmem:[#allocation3 + $0x8] sm:$0xff] %vm1371_vm13, %v1350_v27 }
  0xc2   : > { %1457 = vrot.lane.b32.xlu1 %v1289_v18, %s2732_s6  ;;  %1422 = vst.msk [vmem:[#allocation3 + $0x8] sm:$0xff] %vm1420_vm14, %v1399_v19  ;;  %2531 = vmatpush3.msk.msra.mxu0 %vm1673_vm15, %v1647_v43  ;;  %vm2099_vm15 = vcmask 458112  }
  0xc4   : > { %v1338_v22 = vld [vmem:[#allocation2 + $0x80] sm:$0xff]  ;;  %v1254_v32 = vpop.permute.xlu1 %1253 }
  0xc5   : > { %v1436_v47 = vld [vmem:[#allocation2 + $0x82] sm:$0xff]  ;;  %1361 = vrot.lane.b32.xlu0 %v1338_v22, %s2730_s4  ;;  %1276 = vst.msk [vmem:[#allocation3 + $0x10] sm:$0xff] %vm1273_vm11, %v1254_v32  ;;  %s2738_s4 = smov 56  }
  0xc6   : > { %1459 = vrot.lane.b32.xlu1 %v1436_v47, %s2732_s6  ;;  %v1387_v48 = vld [vmem:[#allocation2 + $0x81] sm:$0xff]  ;;  %s2739_s6 = smov 40  }
  0xc8   : > { %v1446_v42 = vpop.permute.xlu1 %1445 }
  0xc9   : > { %1554 = vrot.lane.b32.xlu0 %v3217_v28, %s2734_s8  ;;  %1470 = vst.msk [vmem:[#allocation3] sm:$0xff] %vm1469_vm1, %v1446_v42 }
  0xca   : > { %1509 = vrot.lane.b32.xlu1 %v3266_v8, %s2733_s7 }
  0xcc   : > { %v1303_v50 = vpop.permute.xlu1 %1302 }
  0xcd   : > { %1410 = vrot.lane.b32.xlu0 %v1387_v48, %s2731_s5  ;;  %1325 = vst.msk [vmem:[#allocation3 + $0x10] sm:$0xff] %vm1322_vm12, %v1303_v50 }
  0xce   : > { %1558 = vrot.lane.b32.xlu1 %v3273_v49, %s2734_s8 }
  0xd0   : > { %v1496_v46 = vpop.permute.xlu1 %1495 }
  0xd1   : > { %1603 = vrot.lane.b32.xlu0 %v1289_v18, %s2735_s9  ;;  %1520 = vst.msk [vmem:[#allocation3] sm:$0xff] %vm1519_vm2, %v1496_v46  ;;  %v1863_v46 = vld [vmem:[#allocation2 + $0x2] sm:$0xff] }
  0xd2   : > { %1607 = vrot.lane.b32.xlu1 %v3279_v52, %s2735_s9 }
  0xd5   : > { %v1256_v44 = vpop.permute.xlu0 %1255  ;;  %1507 = vrot.lane.b32.xlu0 %v1338_v22, %s2733_s7 }
  0xd6   : > { %v1352_v53 = vpop.permute.xlu1 %1351  ;;  %1277 = vst.msk [vmem:[#allocation3 + $0x18] sm:$0xff] %vm1273_vm11, %v1256_v44  ;;  %2089 = vrot.lane.b32.xlu1 %v3266_v8, %s2737_s29 }
  0xd7   : > { %1374 = vst.msk [vmem:[#allocation3 + $0x10] sm:$0xff] %vm1371_vm13, %v1352_v53 }
  0xd9   : > { %v1448_v54 = vpop.permute.xlu0 %1447  ;;  %1556 = vrot.lane.b32.xlu0 %v1387_v48, %s2734_s8  ;;  %v1814_v48 = vld [vmem:[#allocation2 + $0x1] sm:$0xff]  ;;  %s2740_s8 = smov 64  }
  0xda   : > { %v1545_v55 = vpop.permute.xlu1 %1544  ;;  %1471 = vst.msk [vmem:[#allocation3 + $0x8] sm:$0xff] %vm1469_vm1, %v1448_v54  ;;  %2138 = vrot.lane.b32.xlu1 %v3273_v49, %s2738_s4 }
  0xdb   : > { %1569 = vst.msk [vmem:[#allocation3] sm:$0xff] %vm1568_vm3, %v1545_v55 }
  0xdd   : > { %v1305_v41 = vpop.permute.xlu0 %1304  ;;  %1605 = vrot.lane.b32.xlu0 %v1436_v47, %s2735_s9 }
  0xde   : > { %v1401_v28 = vpop.permute.xlu1 %1400  ;;  %1326 = vst.msk [vmem:[#allocation3 + $0x18] sm:$0xff] %vm1322_vm12, %v1305_v41 }
  0xdf   : > { %1423 = vst.msk [vmem:[#allocation3 + $0x10] sm:$0xff] %vm1420_vm14, %v1401_v28 }
  0xe1   : > { %v1498_v56 = vpop.permute.xlu0 %1497  ;;  %1830 = vrot.lane.b32.xlu0 %v1814_v48, %s2729_s30 }
  0xe2   : > { %v1594_v33 = vpop.permute.xlu1 %1593  ;;  %1521 = vst.msk [vmem:[#allocation3 + $0x8] sm:$0xff] %vm1519_vm2, %v1498_v56 }
  0xe3   : > { %1618 = vst.msk [vmem:[#allocation3] sm:$0xff] %vm1617_vm4, %v1594_v33 }
  0xe4   : > { %1627 = vst.msk [vmem:[#allocation3] sm:$0xff] %vm1626_vm5, %v2736_v57 }
  0xe5   : > { %1879 = vrot.lane.b32.xlu0 %v1863_v46, %s2731_s5 }
  0xe9   : > { %v1354_v58 = vpop.permute.xlu0 %1353 }
  0xea   : > { %v1403_v51 = vpop.permute.xlu1 %1402  ;;  %1375 = vst.msk [vmem:[#allocation3 + $0x18] sm:$0xff] %vm1371_vm13, %v1354_v58 }
  0xeb   : > { %v1635_v59 = vld [vmem:[#allocation3] sm:$0xff]  ;;  %1424 = vst.msk [vmem:[#allocation3 + $0x18] sm:$0xff] %vm1420_vm14, %v1403_v51 }
  0xec   : > { %2532 = vmatprep.mubr.msk.f32.mxu0 %vm1648_vm6, %v1635_v59  ;;  %1806 = vst.msk [vmem:[#allocation3] sm:$0xff] %vm1051_vm0, %v2953_v4 }
  0xed   : > { %v1547_v60 = vpop.permute.xlu0 %1546 }
  0xee   : > { %v1596_v61 = vpop.permute.xlu1 %1595  ;;  %1570 = vst.msk [vmem:[#allocation3 + $0x8] sm:$0xff] %vm1568_vm3, %v1547_v60 }
  0xef   : > { %1619 = vst.msk [vmem:[#allocation3 + $0x8] sm:$0xff] %vm1617_vm4, %v1596_v61 }
  0xf0   : > { %1628 = vst.msk [vmem:[#allocation3 + $0x8] sm:$0xff] %vm1626_vm5, %v2736_v57 }
  0xf1   : > { %v1258_v37 = vpop.permute.xlu0 %1257 }
  0xf2   : > { %v1307_v1 = vpop.permute.xlu1 %1306  ;;  %1278 = vst.msk [vmem:[#allocation3 + $0x20] sm:$0xff] %vm1273_vm11, %v1258_v37 }
  0xf3   : > { %1327 = vst.msk [vmem:[#allocation3 + $0x20] sm:$0xff] %vm1322_vm12, %v1307_v1 }
  0xf5   : > { %v1450_v62 = vpop.permute.xlu0 %1449 }
  0xf6   : > { %v1500_v63 = vpop.permute.xlu1 %1499  ;;  %1472 = vst.msk [vmem:[#allocation3 + $0x10] sm:$0xff] %vm1469_vm1, %v1450_v62 }
  0xf7   : > { %1522 = vst.msk [vmem:[#allocation3 + $0x10] sm:$0xff] %vm1519_vm2, %v1500_v63  ;;  %v1636_v4 = vld [vmem:[#allocation3 + $0x8] sm:$0xff] }
  0xf8   : > { %2533 = vmatmul.mubr.msk.f32.vlgmr.msra.gmra.mrb[0].mxu0 %vm1648_vm6, %v1636_v4 }
  0xfc   : > { %v1260_v0 = vpop.permute.xlu0 %1259 }
  0xfd   : > { %v1356_v6 = vpop.permute.xlu1 %1355  ;;  %1279 = vst.msk [vmem:[#allocation3 + $0x28] sm:$0xff] %vm1273_vm11, %v1260_v0 }
  0xfe   : > { %1376 = vst.msk [vmem:[#allocation3 + $0x20] sm:$0xff] %vm1371_vm13, %v1356_v6 }
 0x100   : > { %v1452_v3 = vpop.permute.xlu0 %1451 }
 0x101   : > { %v1549_v45 = vpop.permute.xlu1 %1548  ;;  %1473 = vst.msk [vmem:[#allocation3 + $0x18] sm:$0xff] %vm1469_vm1, %v1452_v3 }
 0x102   : > { %1571 = vst.msk [vmem:[#allocation3 + $0x10] sm:$0xff] %vm1568_vm3, %v1549_v45 }
 0x104   : > { %v1309_v12 = vpop.permute.xlu0 %1308 }
 0x105   : > { %v1405_v13 = vpop.permute.xlu1 %1404  ;;  %1328 = vst.msk [vmem:[#allocation3 + $0x28] sm:$0xff] %vm1322_vm12, %v1309_v12 }
 0x106   : > { %1425 = vst.msk [vmem:[#allocation3 + $0x20] sm:$0xff] %vm1420_vm14, %v1405_v13 }
 0x108   : > { %v1502_v10 = vpop.permute.xlu0 %1501 }
 0x109   : > { %v1598_v14 = vpop.permute.xlu1 %1597  ;;  %1523 = vst.msk [vmem:[#allocation3 + $0x18] sm:$0xff] %vm1519_vm2, %v1502_v10 }
 0x10a   : > { %1620 = vst.msk [vmem:[#allocation3 + $0x10] sm:$0xff] %vm1617_vm4, %v1598_v14 }
 0x10b   : > { %1629 = vst.msk [vmem:[#allocation3 + $0x10] sm:$0xff] %vm1626_vm5, %v2736_v57 }
 0x110   : > { %v1358_v15 = vpop.permute.xlu0 %1357 }
 0x111   : > { %v1407_v5 = vpop.permute.xlu1 %1406  ;;  %1377 = vst.msk [vmem:[#allocation3 + $0x28] sm:$0xff] %vm1371_vm13, %v1358_v15 }
 0x112   : > { %1426 = vst.msk [vmem:[#allocation3 + $0x28] sm:$0xff] %vm1420_vm14, %v1407_v5  ;;  %v1637_v16 = vld [vmem:[#allocation3 + $0x10] sm:$0xff] }
 0x113   : > { %2535 = vmatprep.mubr.msk.f32.mxu0 %vm1648_vm6, %v1637_v16 }
 0x114   : > { %v1551_v17 = vpop.permute.xlu0 %1550 }
 0x115   : > { %v1600_v7 = vpop.permute.xlu1 %1599  ;;  %1572 = vst.msk [vmem:[#allocation3 + $0x18] sm:$0xff] %vm1568_vm3, %v1551_v17 }
 0x116   : > { %1621 = vst.msk [vmem:[#allocation3 + $0x18] sm:$0xff] %vm1617_vm4, %v1600_v7 }
 0x117   : > { %1630 = vst.msk [vmem:[#allocation3 + $0x18] sm:$0xff] %vm1626_vm5, %v2736_v57 }
 0x118   : > { %v1262_v18 = vpop.permute.xlu0 %1261 }
 0x119   : > { %v1311_v11 = vpop.permute.xlu1 %1310  ;;  %1280 = vst.msk [vmem:[#allocation3 + $0x30] sm:$0xff] %vm1273_vm11, %v1262_v18 }
 0x11a   : > { %1329 = vst.msk [vmem:[#allocation3 + $0x30] sm:$0xff] %vm1322_vm12, %v1311_v11 }
 0x11c   : > { %v1454_v20 = vpop.permute.xlu0 %1453 }
 0x11d   : > { %v1504_v21 = vpop.permute.xlu1 %1503  ;;  %1474 = vst.msk [vmem:[#allocation3 + $0x20] sm:$0xff] %vm1469_vm1, %v1454_v20 }
 0x11e   : > { %v1638_v29 = vld [vmem:[#allocation3 + $0x18] sm:$0xff]  ;;  %1524 = vst.msk [vmem:[#allocation3 + $0x20] sm:$0xff] %vm1519_vm2, %v1504_v21 }
 0x11f   : > { %2536 = vmatmul.mubr.msk.f32.gmra.mrb[2].mxu0 %vm1648_vm6, %v1638_v29 }
 0x123   : > { %v1264_v30 = vpop.permute.xlu0 %1263 }
 0x124   : > { %v1360_v2 = vpop.permute.xlu1 %1359  ;;  %1281 = vst.msk [vmem:[#allocation3 + $0x38] sm:$0xff] %vm1273_vm11, %v1264_v30  ;;  %vm2258_vm11 = vcmask 1040384  }
 0x125   : > { %1378 = vst.msk [vmem:[#allocation3 + $0x30] sm:$0xff] %vm1371_vm13, %v1360_v2 }
 0x127   : > { %v1456_v23 = vpop.permute.xlu0 %1455 }
 0x128   : > { %v1553_v24 = vpop.permute.xlu1 %1552  ;;  %1475 = vst.msk [vmem:[#allocation3 + $0x28] sm:$0xff] %vm1469_vm1, %v1456_v23 }
 0x129   : > { %1573 = vst.msk [vmem:[#allocation3 + $0x20] sm:$0xff] %vm1568_vm3, %v1553_v24 }
 0x12b   : > { %v1313_v25 = vpop.permute.xlu0 %1312 }
 0x12c   : > { %v1409_v31 = vpop.permute.xlu1 %1408  ;;  %1330 = vst.msk [vmem:[#allocation3 + $0x38] sm:$0xff] %vm1322_vm12, %v1313_v25  ;;  %vm2741_vm12 = vmmov 1  }
 0x12d   : > { %1427 = vst.msk [vmem:[#allocation3 + $0x30] sm:$0xff] %vm1420_vm14, %v1409_v31 }
 0x12f   : > { %v1506_v34 = vpop.permute.xlu0 %1505 }
 0x130   : > { %v1602_v9 = vpop.permute.xlu1 %1601  ;;  %1525 = vst.msk [vmem:[#allocation3 + $0x28] sm:$0xff] %vm1519_vm2, %v1506_v34  ;;  %v2223_v34 = vld [vmem:[%s3652_s2] sm:$0xff] }
 0x131   : > { %1622 = vst.msk [vmem:[#allocation3 + $0x20] sm:$0xff] %vm1617_vm4, %v1602_v9  ;;  %v2224_v9 = vld [vmem:[%s3652_s2 + $0x8] sm:$0xff] }
 0x132   : > { %1631 = vst.msk [vmem:[#allocation3 + $0x20] sm:$0xff] %vm1626_vm5, %v2736_v57 }
 0x134   : > { %v1458_v35 = vpop.permute.xlu1 %1457 }
 0x135   : > { %1476 = vst.msk [vmem:[#allocation3 + $0x30] sm:$0xff] %vm1469_vm1, %v1458_v35  ;;  %v2584_v35 = vpack.c.bf16 %v2224_v9, %v2223_v34 }
 0x137   : > { %v1362_v36 = vpop.permute.xlu0 %1361  ;;  %2585 = vmatprep.subr.bf16.mxu1 %v2584_v35 }
 0x138   : > { %v1460_v38 = vpop.permute.xlu1 %1459  ;;  %1379 = vst.msk [vmem:[#allocation3 + $0x38] sm:$0xff] %vm1371_vm13, %v1362_v36  ;;  %2587 = vmatpush3.bf16.msra.mxu1 %v2584_v35  ;;  %vm2601_vm13 = vmpackc.low %vm2258_vm11, %vm2741_vm12 }
 0x139   : > { %v1639_v26 = vld [vmem:[#allocation3 + $0x20] sm:$0xff] }
 0x13a   : > { %2538 = vmatprep.mubr.msk.f32.mxu0 %vm1648_vm6, %v1639_v26 }
 0x13b   : > { %v1555_v39 = vpop.permute.xlu0 %1554 }
 0x13c   : > { %v1510_v40 = vpop.permute.xlu1 %1509  ;;  %1574 = vst.msk [vmem:[#allocation3 + $0x28] sm:$0xff] %vm1568_vm3, %v1555_v39  ;;  %v2225_v39 = vld [vmem:[%s3652_s2 + $0x10] sm:$0xff] }
 0x13f   : > { %v1411_v43 = vpop.permute.xlu0 %1410 }
 0x140   : > { %v1559_v27 = vpop.permute.xlu1 %1558  ;;  %1428 = vst.msk [vmem:[#allocation3 + $0x38] sm:$0xff] %vm1420_vm14, %v1411_v43  ;;  %vm2050_vm14 = vcmask 392512  }
 0x141   : > { %1477 = vst.msk [vmem:[#allocation3 + $0x38] sm:$0xff] %vm1469_vm1, %v1460_v38  ;;  %vm2148_vm1 = vcmask 523712  }
 0x142   : > { %1527 = vst.msk [vmem:[#allocation3 + $0x38] sm:$0xff] %vm1519_vm2, %v1510_v40  ;;  %v2226_v40 = vld [vmem:[%s3652_s2 + $0x18] sm:$0xff] }
 0x143   : > { %v1604_v19 = vpop.permute.xlu0 %1603  ;;  %1576 = vst.msk [vmem:[#allocation3 + $0x38] sm:$0xff] %vm1568_vm3, %v1559_v27  ;;  %v2588_v43 = vpack.c.bf16 %v2226_v40, %v2225_v39 }
 0x144   : > { %v1608_v22 = vpop.permute.xlu1 %1607  ;;  %1623 = vst.msk [vmem:[#allocation3 + $0x28] sm:$0xff] %vm1617_vm4, %v1604_v19 }
 0x145   : > { %1625 = vst.msk [vmem:[#allocation3 + $0x38] sm:$0xff] %vm1617_vm4, %v1608_v22  ;;  %2589 = vmatprep.subr.bf16.mxu1 %v2588_v43 }
 0x146   : > { %1632 = vst.msk [vmem:[#allocation3 + $0x28] sm:$0xff] %vm1626_vm5, %v2736_v57  ;;  %1634 = vst.msk [vmem:[#allocation3 + $0x38] sm:$0xff] %vm1626_vm5, %v2736_v57  ;;  %2591 = vmatpush3.bf16.msra.mxu1 %v2588_v43 }
 0x147   : > { %v1508_v32 = vpop.permute.xlu0 %1507 }
 0x148   : > { %1526 = vst.msk [vmem:[#allocation3 + $0x30] sm:$0xff] %vm1519_vm2, %v1508_v32  ;;  %v3431_v2 = vpop.permute.xlu1 %2089  ;;  %v2227_v32 = vld [vmem:[%s3652_s2 + $0x20] sm:$0xff]  ;;  %vm2197_vm2 = vcmask 589312  }
 0x14b   : > { %v1557_v47 = vpop.permute.xlu0 %1556 }
 0x14c   : > { %1575 = vst.msk [vmem:[#allocation3 + $0x30] sm:$0xff] %vm1568_vm3, %v1557_v47  ;;  %v3435_v23 = vpop.permute.xlu1 %2138  ;;  %v2228_v47 = vld [vmem:[%s3652_s2 + $0x28] sm:$0xff]  ;;  %vm2206_vm3 = vcmask 597568  }
 0x14d   : > { %v1640_v42 = vld [vmem:[#allocation3 + $0x28] sm:$0xff]  ;;  %v1642_v44 = vld [vmem:[#allocation3 + $0x38] sm:$0xff] }
 0x14e   : > { %2539 = vmatmul.mubr.msk.f32.gmra.mrb[4].mxu0 %vm1648_vm6, %v1640_v42  ;;  %v2592_v42 = vpack.c.bf16 %v2228_v47, %v2227_v32 }
 0x14f   : > { %v1606_v50 = vpop.permute.xlu0 %1605 }
 0x150   : > { %1624 = vst.msk [vmem:[#allocation3 + $0x30] sm:$0xff] %vm1617_vm4, %v1606_v50  ;;  %2593 = vmatprep.subr.bf16.mxu1 %v2592_v42  ;;  %vm2233_vm4 = vcmask 596992  }
 0x151   : > { %1633 = vst.msk [vmem:[#allocation3 + $0x30] sm:$0xff] %vm1626_vm5, %v2736_v57  ;;  %2595 = vmatpush3.bf16.msra.mxu1 %v2592_v42 }
 0x153   : > { %v1831_v58 = vpop.permute.xlu0 %1830 }
 0x154   : > { %1855 = vst.msk [vmem:[#allocation3] sm:$0xff] %vm1854_vm7, %v1831_v58 }
 0x157   : > { %v1880_v51 = vpop.permute.xlu0 %1879 }
 0x158   : > { %v1641_v53 = vld [vmem:[#allocation3 + $0x30] sm:$0xff]  ;;  %1904 = vst.msk [vmem:[#allocation3] sm:$0xff] %vm1903_vm8, %v1880_v51 }
 0x159   : > { %2541 = vmatprep.mubr.msk.f32.mxu0 %vm1648_vm6, %v1641_v53  ;;  %v2230_v53 = vld [vmem:[%s3652_s2 + $0x38] sm:$0xff] }
 0x15a   : > { %2542 = vmatmul.mubr.msk.f32.gmra.mrb[6].mxu0 %vm1648_vm6, %v1642_v44  ;;  %v2229_v44 = vld [vmem:[%s3652_s2 + $0x30] sm:$0xff] }
 0x1cb   : > { %v2534_v8 = vpop.f32.mrb[0].mxu0 }
 0x1cc   : > { %v1783_v54 = vmax.f32 %v2534_v8, 0.0  ;;  %v1743_v55 = vpop.f32.mrb[1].mxu0  ;;  %v2596_v8 = vpack.c.bf16 %v2230_v53, %v2229_v44 }
 0x1cd   : > { %v1782_v41 = vmax.f32 %v1743_v55, 0.0 }
 0x1ce   : > { %1791 = vst.msk [vmem:[#allocation2 + $0x21] sm:$0xff] %vm1051_vm0, %v1783_v54  ;;  %2597 = vmatprep.subr.bf16.mxu1 %v2596_v8 }
 0x1cf   : > { %1790 = vst.msk [vmem:[#allocation2 + $0x11] sm:$0xff] %vm1051_vm0, %v1782_v41  ;;  %v2231_v41 = vld [vmem:[%s3652_s2 + $0x40] sm:$0xff]  ;;  %2599 = vmatpush3.bf16.msra.mxu1 %v2596_v8 }
 0x1d5   : > { %v1913_v28 = vld [vmem:[#allocation2 + $0x20] sm:$0xff] }
 0x1d6   : > { %v1962_v56 = vld [vmem:[#allocation2 + $0x21] sm:$0xff]  ;;  %1930 = vrot.lane.b32.xlu1 %v1913_v28, %s2733_s7  ;;  %v1912_v49 = vld [vmem:[#allocation2 + $0x10] sm:$0xff]  ;;  %1808 = vst.msk [vmem:[#allocation3 + $0x10] sm:$0xff] %vm1051_vm0, %v1913_v28 }
 0x1d7   : > { %1979 = vrot.lane.b32.xlu0 %v1962_v56, %s2735_s9  ;;  %v2011_v33 = vld [vmem:[#allocation2 + $0x22] sm:$0xff]  ;;  %1807 = vst.msk [vmem:[#allocation3 + $0x8] sm:$0xff] %vm1051_vm0, %v1912_v49  ;;  %v1961_v59 = vld [vmem:[#allocation2 + $0x11] sm:$0xff] }
 0x1d8   : > { %v1864_v60 = vld [vmem:[#allocation2 + $0x12] sm:$0xff] }
 0x1da   : > { %1834 = vrot.lane.b32.xlu1 %v1962_v56, %s2729_s30 }
 0x1db   : > { %2028 = vrot.lane.b32.xlu0 %v2011_v33, %s2739_s6 }
 0x1de   : > { %1883 = vrot.lane.b32.xlu1 %v2011_v33, %s2731_s5 }
 0x1df   : > { %1928 = vrot.lane.b32.xlu0 %v1912_v49, %s2733_s7 }
 0x1e2   : > { %2075 = vrot.lane.b32.xlu1 %v1913_v28, %s2737_s29  ;;  %v2232_v28 = vld [vmem:[%s3652_s2 + $0x48] sm:$0x1] }
 0x1e3   : > { %1977 = vrot.lane.b32.xlu0 %v1961_v59, %s2735_s9 }
 0x1e6   : > { %2124 = vrot.lane.b32.xlu1 %v1962_v56, %s2738_s4  ;;  %v2600_v56 = vpack.c.bf16 %v2232_v28, %v2231_v41 }
 0x1e8   : > { %2602 = vmatprep.subr.msk.bf16.mxu1 %vm2601_vm13, %v2600_v56 }
 0x1e9   : > { %2605 = vmatpush3.bf16.msk.msra.mxu1 %vm2601_vm13, %v2600_v56 }
 0x1ea   : > { %2173 = vrot.lane.b32.xlu1 %v2011_v33, %s2740_s8 }
 0x1ee   : > { %1832 = vrot.lane.b32.xlu1 %v1961_v59, %s2729_s30 }
 0x1f2   : > { %v2537_v61 = vpop.f32.mrb[2].mxu0  ;;  %1881 = vrot.lane.b32.xlu1 %v1864_v60, %s2731_s5 }
 0x1f3   : > { %v1785_v37 = vmax.f32 %v2537_v61, 0.0  ;;  %v1753_v1 = vpop.f32.mrb[3].mxu0 }
 0x1f4   : > { %v1784_v62 = vmax.f32 %v1753_v1, 0.0 }
 0x1f5   : > { %1793 = vst.msk [vmem:[#allocation2 + $0x41] sm:$0xff] %vm1051_vm0, %v1785_v37 }
 0x1f6   : > { %1792 = vst.msk [vmem:[#allocation2 + $0x31] sm:$0xff] %vm1051_vm0, %v1784_v62  ;;  %2026 = vrot.lane.b32.xlu1 %v1864_v60, %s2739_s6 }
 0x1fc   : > { %v1915_v63 = vld [vmem:[#allocation2 + $0x40] sm:$0xff] }
 0x1fd   : > { %v1964_v4 = vld [vmem:[#allocation2 + $0x41] sm:$0xff]  ;;  %1934 = vrot.lane.b32.xlu0 %v1915_v63, %s2733_s7  ;;  %v2060_v0 = vld [vmem:[#allocation2 + $0x30] sm:$0xff]  ;;  %1810 = vst.msk [vmem:[#allocation3 + $0x20] sm:$0xff] %vm1051_vm0, %v1915_v63 }
 0x1fe   : > { %1983 = vrot.lane.b32.xlu1 %v1964_v4, %s2735_s9  ;;  %1809 = vst.msk [vmem:[#allocation3 + $0x18] sm:$0xff] %vm1051_vm0, %v2060_v0  ;;  %v1867_v6 = vld [vmem:[#allocation2 + $0x42] sm:$0xff]  ;;  %v1817_v3 = vld [vmem:[#allocation2 + $0x31] sm:$0xff] }
 0x1ff   : > { %v1866_v45 = vld [vmem:[#allocation2 + $0x32] sm:$0xff] }
 0x201   : > { %1838 = vrot.lane.b32.xlu0 %v1964_v4, %s2729_s30 }
 0x202   : > { %1887 = vrot.lane.b32.xlu1 %v1867_v6, %s2731_s5 }
 0x205   : > { %2032 = vrot.lane.b32.xlu0 %v1867_v6, %s2739_s6 }
 0x206   : > { %2079 = vrot.lane.b32.xlu1 %v1915_v63, %s2737_s29 }
 0x209   : > { %1836 = vrot.lane.b32.xlu0 %v1817_v3, %s2729_s30 }
 0x20a   : > { %2128 = vrot.lane.b32.xlu1 %v1964_v4, %s2738_s4 }
 0x20d   : > { %1885 = vrot.lane.b32.xlu0 %v1866_v45, %s2731_s5 }
 0x20e   : > { %2177 = vrot.lane.b32.xlu1 %v1867_v6, %s2740_s8 }
 0x211   : > { %2077 = vrot.lane.b32.xlu0 %v2060_v0, %s2737_s29 }
 0x212   : > { %1932 = vrot.lane.b32.xlu1 %v2060_v0, %s2733_s7 }
 0x215   : > { %2126 = vrot.lane.b32.xlu0 %v1817_v3, %s2738_s4 }
 0x216   : > { %1981 = vrot.lane.b32.xlu1 %v1817_v3, %s2735_s9 }
 0x219   : > { %2030 = vrot.lane.b32.xlu0 %v1866_v45, %s2739_s6 }
 0x21a   : > { %2175 = vrot.lane.b32.xlu1 %v1866_v45, %s2740_s8 }
 0x221   : > { %v2540_v12 = vpop.f32.mrb[4].mxu0 }
 0x222   : > { %v1787_v13 = vmax.f32 %v2540_v12, 0.0  ;;  %v1763_v10 = vpop.f32.mrb[5].mxu0 }
 0x223   : > { %v1786_v14 = vmax.f32 %v1763_v10, 0.0 }
 0x224   : > { %1795 = vst.msk [vmem:[#allocation2 + $0x61] sm:$0xff] %vm1051_vm0, %v1787_v13 }
 0x225   : > { %1794 = vst.msk [vmem:[#allocation2 + $0x51] sm:$0xff] %vm1051_vm0, %v1786_v14 }
 0x22b   : > { %v1917_v15 = vld [vmem:[#allocation2 + $0x60] sm:$0xff] }
 0x22c   : > { %v1966_v5 = vld [vmem:[#allocation2 + $0x61] sm:$0xff]  ;;  %1938 = vrot.lane.b32.xlu0 %v1917_v15, %s2733_s7  ;;  %v2062_v16 = vld [vmem:[#allocation2 + $0x50] sm:$0xff]  ;;  %1812 = vst.msk [vmem:[#allocation3 + $0x30] sm:$0xff] %vm1051_vm0, %v1917_v15 }
 0x22d   : > { %1987 = vrot.lane.b32.xlu1 %v1966_v5, %s2735_s9  ;;  %1811 = vst.msk [vmem:[#allocation3 + $0x28] sm:$0xff] %vm1051_vm0, %v2062_v16  ;;  %v2543_v17 = vpop.f32.mrb[6].mxu0  ;;  %v1869_v7 = vld [vmem:[#allocation2 + $0x62] sm:$0xff]  ;;  %v1819_v21 = vld [vmem:[#allocation2 + $0x51] sm:$0xff] }
 0x22e   : > { %v1789_v18 = vmax.f32 %v2543_v17, 0.0  ;;  %v1773_v11 = vpop.f32.mrb[7].mxu0  ;;  %v1868_v30 = vld [vmem:[#allocation2 + $0x52] sm:$0xff] }
 0x22f   : > { %v1788_v20 = vmax.f32 %v1773_v11, 0.0 }
 0x230   : > { %1842 = vrot.lane.b32.xlu0 %v1966_v5, %s2729_s30  ;;  %1797 = vst.msk [vmem:[#allocation2 + $0x81] sm:$0xff] %vm1051_vm0, %v1789_v18 }
 0x231   : > { %1891 = vrot.lane.b32.xlu1 %v1869_v7, %s2731_s5  ;;  %1796 = vst.msk [vmem:[#allocation2 + $0x71] sm:$0xff] %vm1051_vm0, %v1788_v20 }
 0x234   : > { %2036 = vrot.lane.b32.xlu0 %v1869_v7, %s2739_s6 }
 0x235   : > { %2083 = vrot.lane.b32.xlu1 %v1917_v15, %s2737_s29 }
 0x237   : > { %v1919_v31 = vld [vmem:[#allocation2 + $0x80] sm:$0xff] }
 0x238   : > { %1840 = vrot.lane.b32.xlu0 %v1819_v21, %s2729_s30  ;;  %v3425_v29 = vld [vmem:[#allocation2 + $0x70] sm:$0xff]  ;;  %v3451_v36 = vld [vmem:[#allocation2 + $0x82] sm:$0xff] }
 0x239   : > { %2132 = vrot.lane.b32.xlu1 %v1966_v5, %s2738_s4  ;;  %1813 = vst.msk [vmem:[#allocation3 + $0x38] sm:$0xff] %vm1051_vm0, %v3425_v29  ;;  %v1968_v27 = vld [vmem:[#allocation2 + $0x81] sm:$0xff]  ;;  %v1967_v48 = vld [vmem:[#allocation2 + $0x71] sm:$0xff] }
 0x23a   : > { %v2016_v54 = vld [vmem:[#allocation2 + $0x72] sm:$0xff] }
 0x23c   : > { %1889 = vrot.lane.b32.xlu0 %v1868_v30, %s2731_s5 }
 0x23d   : > { %2181 = vrot.lane.b32.xlu1 %v1869_v7, %s2740_s8 }
 0x240   : > { %2081 = vrot.lane.b32.xlu0 %v2062_v16, %s2737_s29 }
 0x241   : > { %1936 = vrot.lane.b32.xlu1 %v2062_v16, %s2733_s7 }
 0x244   : > { %2130 = vrot.lane.b32.xlu0 %v1819_v21, %s2738_s4 }
 0x245   : > { %1985 = vrot.lane.b32.xlu1 %v1819_v21, %s2735_s9 }
 0x248   : > { %2034 = vrot.lane.b32.xlu0 %v1868_v30, %s2739_s6  ;;  %v3441_v24 = vpop.permute.xlu1 %1930 }
 0x249   : > { %2179 = vrot.lane.b32.xlu1 %v1868_v30, %s2740_s8  ;;  %v3443_v25 = vpop.permute.xlu0 %1979 }
 0x24c   : > { %1942 = vrot.lane.b32.xlu0 %v1919_v31, %s2733_s7  ;;  %v1835_v38 = vpop.permute.xlu1 %1834 }
 0x24d   : > { %2040 = vrot.lane.b32.xlu1 %v3451_v36, %s2739_s6  ;;  %v2029_v26 = vpop.permute.xlu0 %2028  ;;  %1857 = vst.msk [vmem:[#allocation3 + $0x10] sm:$0xff] %vm1854_vm7, %v1835_v38 }
 0x250   : > { %1991 = vrot.lane.b32.xlu0 %v1968_v27, %s2735_s9  ;;  %v1884_v19 = vpop.permute.xlu1 %1883 }
 0x251   : > { %1940 = vrot.lane.b32.xlu1 %v3425_v29, %s2733_s7  ;;  %v1929_v22 = vpop.permute.xlu0 %1928  ;;  %1906 = vst.msk [vmem:[#allocation3 + $0x10] sm:$0xff] %vm1903_vm8, %v1884_v19  ;;  %s2742_s7 = smov [#allocation4]  }
 0x252   : > { %1953 = vst.msk [vmem:[#allocation3] sm:$0xff] %vm1952_vm9, %v1929_v22  ;;  %s2666_s17 = sshll.u32 %s2742_s7, 4  ;;  %s2667_s17 = int_to_ptr.vmem [resolvable:$false] %s2666_s17 }
 0x253   : > { %s2668_s19 = scalar_lea.vmem %s2667_s17, 2048 }
 0x254   : > { %2087 = vrot.lane.b32.xlu0 %v1919_v31, %s2737_s29  ;;  %v2076_v50 = vpop.permute.xlu1 %2075 }
 0x255   : > { %1989 = vrot.lane.b32.xlu1 %v1967_v48, %s2735_s9  ;;  %v1978_v46 = vpop.permute.xlu0 %1977 }
 0x256   : > { %2002 = vst.msk [vmem:[#allocation3] sm:$0xff] %vm2001_vm10, %v1978_v46 }
 0x258   : > { %2136 = vrot.lane.b32.xlu0 %v1968_v27, %s2738_s4  ;;  %v2125_v55 = vpop.permute.xlu1 %2124 }
 0x259   : > { %2038 = vrot.lane.b32.xlu1 %v2016_v54, %s2739_s6  ;;  %s2490_s6 = sshll.u32 %s2785_s16, 10 }
 0x25a   : > { %s3600_s10 = scalar_lea.hbm %s3653_s3, %s2490_s6 }
 0x25c   : > { %1844 = vrot.lane.b32.xlu0 %v1967_v48, %s2729_s30  ;;  %v2174_v49 = vpop.permute.xlu1 %2173 }
 0x25d   : > { %2187 = vrot.lane.b32.xlu1 %v3279_v52, %s2740_s8 }
 0x260   : > { %1893 = vrot.lane.b32.xlu0 %v2016_v54, %s2731_s5  ;;  %v1833_v33 = vpop.permute.xlu1 %1832  ;;  %s161_s5 = sand.u32 1, %s2716_s13  }
 0x261   : > { %1856 = vst.msk [vmem:[#allocation3 + $0x8] sm:$0xff] %vm1854_vm7, %v1833_v33  ;;  %s3608_s16 = scalar_lea.sflag [#allocation5], %s161_s5 }
 0x264   : > { %2085 = vrot.lane.b32.xlu0 %v3425_v29, %s2737_s29  ;;  %v1882_v58 = vpop.permute.xlu1 %1881  ;;  %s2463_s29 = sshll.u32 %s161_s5, 6 }
 0x265   : > { %1905 = vst.msk [vmem:[#allocation3 + $0x8] sm:$0xff] %vm1903_vm8, %v1882_v58 }
 0x266   : > { %1954 = vst.msk [vmem:[#allocation3 + $0x8] sm:$0xff] %vm1952_vm9, %v3441_v24 }
 0x267   : > { %2003 = vst.msk [vmem:[#allocation3 + $0x8] sm:$0xff] %vm2001_vm10, %v3443_v25 }
 0x268   : > { %2134 = vrot.lane.b32.xlu0 %v1967_v48, %s2738_s4  ;;  %v2027_v52 = vpop.permute.xlu1 %2026  ;;  %2052 = vst.msk [vmem:[#allocation3 + $0x8] sm:$0xff] %vm2050_vm14, %v2029_v26  ;;  %s163_s4 = scalar_lea.vmem [#allocation4], %s2463_s29 }
 0x269   : > { %2051 = vst.msk [vmem:[#allocation3] sm:$0xff] %vm2050_vm14, %v2027_v52 }
 0x26a   : > { %2100 = vst.msk [vmem:[#allocation3] sm:$0xff] %vm2099_vm15, %v2076_v50 }
 0x26b   : > { %2149 = vst.msk [vmem:[#allocation3] sm:$0xff] %vm2148_vm1, %v2125_v55 }
 0x26c   : > { %2183 = vrot.lane.b32.xlu0 %v2016_v54, %s2740_s8  ;;  %2198 = vst.msk [vmem:[#allocation3] sm:$0xff] %vm2197_vm2, %v2174_v49 }
 0x26d   : > { %2207 = vst.msk [vmem:[#allocation3] sm:$0xff] %vm2206_vm3, %v2736_v57 }
 0x26f   : > { %v1935_v51 = vpop.permute.xlu0 %1934 }
 0x270   : > { %v1984_v59 = vpop.permute.xlu1 %1983  ;;  %2185 = vrot.lane.b32.xlu0 %v3451_v36, %s2740_s8  ;;  %s2397_s8 = sshll.u32 %s163_s4, 4  ;;  %s3602_s8 = int_to_ptr.vmem [resolvable:$true] %s2397_s8 }
 0x271   : > { %s2662_s11 = scalar_lea.vmem %s3602_s8, 1024  ;;  %p2669_p0 = scmp.lt.s32.totalorder %s3602_s8, %s2667_s17 }
 0x272   : > { %p2663_p11 = scmp.ne.s32.totalorder %s3602_s8, %s2662_s11  ;;  %p2670_p1 = scmp.lt.s32.totalorder %s2668_s19, %s2662_s11 }
 0x273   : > { %v1839_v60 = vpop.permute.xlu0 %1838 }
 0x274   : > { %v1888_v61 = vpop.permute.xlu1 %1887  ;;  %1859 = vst.msk [vmem:[#allocation3 + $0x20] sm:$0xff] %vm1854_vm7, %v1839_v60  ;;  %v2215_v37 = vld [vmem:[#allocation3] sm:$0xff]  ;;  %p2664_p12 = pnand %p2663_p11, %p2802_p5  ;;  %p2671_p2 = por %p2670_p1, %p2669_p0 }
 0x275   : > { %1908 = vst.msk [vmem:[#allocation3 + $0x20] sm:$0xff] %vm1903_vm8, %v1888_v61  ;;  %2564 = vmatprep.mubr.msk.f32.mxu1 %vm2233_vm4, %v2215_v37 }
 0x276   : > { %p2665_p13 = pneg %p2664_p12 }
 0x277   : > { %v2033_v1 = vpop.permute.xlu0 %2032 }
 0x278   : > { %v2080_v62 = vpop.permute.xlu1 %2079  ;;  %p2672_p3 = pnand %p2671_p2, %p2665_p13 }
 0x27b   : > { %v1837_v63 = vpop.permute.xlu0 %1836 }
 0x27c   : > { %v2129_v4 = vpop.permute.xlu1 %2128  ;;  %1858 = vst.msk [vmem:[#allocation3 + $0x18] sm:$0xff] %vm1854_vm7, %v1837_v63 }
 0x27f   : > { %v1886_v0 = vpop.permute.xlu0 %1885 }
 0x280   : > { %v2178_v6 = vpop.permute.xlu1 %2177  ;;  %1907 = vst.msk [vmem:[#allocation3 + $0x18] sm:$0xff] %vm1903_vm8, %v1886_v0 }
 0x281   : > { %1956 = vst.msk [vmem:[#allocation3 + $0x18] sm:$0xff] %vm1952_vm9, %v1935_v51 }
 0x282   : > { %2005 = vst.msk [vmem:[#allocation3 + $0x18] sm:$0xff] %vm2001_vm10, %v1984_v59 }
 0x283   : > { %2054 = vst.msk [vmem:[#allocation3 + $0x18] sm:$0xff] %vm2050_vm14, %v2033_v1  ;;  %v2078_v3 = vpop.permute.xlu0 %2077 }
 0x284   : > { %v1933_v45 = vpop.permute.xlu1 %1932  ;;  %2101 = vst.msk [vmem:[#allocation3 + $0x8] sm:$0xff] %vm2099_vm15, %v2078_v3 }
 0x285   : > { %1955 = vst.msk [vmem:[#allocation3 + $0x10] sm:$0xff] %vm1952_vm9, %v1933_v45 }
 0x287   : > { %v2127_v12 = vpop.permute.xlu0 %2126 }
 0x288   : > { %v1982_v13 = vpop.permute.xlu1 %1981  ;;  %2150 = vst.msk [vmem:[#allocation3 + $0x8] sm:$0xff] %vm2148_vm1, %v2127_v12 }
 0x289   : > { %2004 = vst.msk [vmem:[#allocation3 + $0x10] sm:$0xff] %vm2001_vm10, %v1982_v13 }
 0x28b   : > { %v2031_v10 = vpop.permute.xlu0 %2030 }
 0x28c   : > { %v2176_v14 = vpop.permute.xlu1 %2175  ;;  %2053 = vst.msk [vmem:[#allocation3 + $0x10] sm:$0xff] %vm2050_vm14, %v2031_v10 }
 0x28d   : > { %2199 = vst.msk [vmem:[#allocation3 + $0x8] sm:$0xff] %vm2197_vm2, %v2176_v14 }
 0x28e   : > { %2102 = vst.msk [vmem:[#allocation3 + $0x10] sm:$0xff] %vm2099_vm15, %v2080_v62 }
 0x28f   : > { %2208 = vst.msk [vmem:[#allocation3 + $0x8] sm:$0xff] %vm2206_vm3, %v2736_v57 }
 0x290   : > { %2151 = vst.msk [vmem:[#allocation3 + $0x10] sm:$0xff] %vm2148_vm1, %v2129_v4 }
 0x291   : > { %2200 = vst.msk [vmem:[#allocation3 + $0x10] sm:$0xff] %vm2197_vm2, %v2178_v6 }
 0x292   : > { %2209 = vst.msk [vmem:[#allocation3 + $0x10] sm:$0xff] %vm2206_vm3, %v2736_v57 }
 0x296   : > { %v2216_v15 = vld [vmem:[#allocation3 + $0x8] sm:$0xff] }
 0x297   : > { %2565 = vmatmul.mubr.msk.f32.vlgmr.msra.gmra.mrb[0].mxu1 %vm2233_vm4, %v2216_v15 }
 0x299   : > { %v2217_v5 = vld [vmem:[#allocation3 + $0x10] sm:$0xff] }
 0x29a   : > { %2567 = vmatprep.mubr.msk.f32.mxu1 %vm2233_vm4, %v2217_v5 }
 0x29e   : > { %v1939_v16 = vpop.permute.xlu0 %1938 }
 0x29f   : > { %v1988_v17 = vpop.permute.xlu1 %1987 }
 0x2a2   : > { %v1843_v7 = vpop.permute.xlu0 %1842 }
 0x2a3   : > { %v1892_v18 = vpop.permute.xlu1 %1891  ;;  %1861 = vst.msk [vmem:[#allocation3 + $0x30] sm:$0xff] %vm1854_vm7, %v1843_v7 }
 0x2a4   : > { %1910 = vst.msk [vmem:[#allocation3 + $0x30] sm:$0xff] %vm1903_vm8, %v1892_v18 }
 0x2a6   : > { %v2037_v11 = vpop.permute.xlu0 %2036 }
 0x2a7   : > { %v2084_v20 = vpop.permute.xlu1 %2083 }
 0x2aa   : > { %v1841_v21 = vpop.permute.xlu0 %1840 }
 0x2ab   : > { %v2133_v29 = vpop.permute.xlu1 %2132  ;;  %1860 = vst.msk [vmem:[#allocation3 + $0x28] sm:$0xff] %vm1854_vm7, %v1841_v21 }
 0x2ae   : > { %v1890_v30 = vpop.permute.xlu0 %1889 }
 0x2af   : > { %v2182_v24 = vpop.permute.xlu1 %2181  ;;  %1909 = vst.msk [vmem:[#allocation3 + $0x28] sm:$0xff] %vm1903_vm8, %v1890_v30 }
 0x2b0   : > { %1958 = vst.msk [vmem:[#allocation3 + $0x28] sm:$0xff] %vm1952_vm9, %v1939_v16 }
 0x2b1   : > { %2007 = vst.msk [vmem:[#allocation3 + $0x28] sm:$0xff] %vm2001_vm10, %v1988_v17 }
 0x2b2   : > { %2056 = vst.msk [vmem:[#allocation3 + $0x28] sm:$0xff] %vm2050_vm14, %v2037_v11  ;;  %v2082_v25 = vpop.permute.xlu0 %2081 }
 0x2b3   : > { %v1937_v31 = vpop.permute.xlu1 %1936  ;;  %2103 = vst.msk [vmem:[#allocation3 + $0x18] sm:$0xff] %vm2099_vm15, %v2082_v25 }
 0x2b4   : > { %1957 = vst.msk [vmem:[#allocation3 + $0x20] sm:$0xff] %vm1952_vm9, %v1937_v31 }
 0x2b6   : > { %v2131_v34 = vpop.permute.xlu0 %2130 }
 0x2b7   : > { %v1986_v9 = vpop.permute.xlu1 %1985  ;;  %2152 = vst.msk [vmem:[#allocation3 + $0x18] sm:$0xff] %vm2148_vm1, %v2131_v34 }
 0x2b8   : > { %2006 = vst.msk [vmem:[#allocation3 + $0x20] sm:$0xff] %vm2001_vm10, %v1986_v9 }
 0x2ba   : > { %v2035_v35 = vpop.permute.xlu0 %2034 }
 0x2bb   : > { %v2180_v36 = vpop.permute.xlu1 %2179  ;;  %2055 = vst.msk [vmem:[#allocation3 + $0x20] sm:$0xff] %vm2050_vm14, %v2035_v35 }
 0x2bc   : > { %2201 = vst.msk [vmem:[#allocation3 + $0x18] sm:$0xff] %vm2197_vm2, %v2180_v36 }
 0x2bd   : > { %2104 = vst.msk [vmem:[#allocation3 + $0x20] sm:$0xff] %vm2099_vm15, %v2084_v20 }
 0x2be   : > { %2210 = vst.msk [vmem:[#allocation3 + $0x18] sm:$0xff] %vm2206_vm3, %v2736_v57  ;;  %v1943_v38 = vpop.permute.xlu0 %1942 }
 0x2bf   : > { %2153 = vst.msk [vmem:[#allocation3 + $0x20] sm:$0xff] %vm2148_vm1, %v2133_v29  ;;  %v2041_v26 = vpop.permute.xlu1 %2040 }
 0x2c0   : > { %2202 = vst.msk [vmem:[#allocation3 + $0x20] sm:$0xff] %vm2197_vm2, %v2182_v24 }
 0x2c1   : > { %2211 = vst.msk [vmem:[#allocation3 + $0x20] sm:$0xff] %vm2206_vm3, %v2736_v57 }
 0x2c2   : > { %v1992_v39 = vpop.permute.xlu0 %1991 }
 0x2c3   : > { %v1941_v40 = vpop.permute.xlu1 %1940 }
 0x2c4   : > { %1959 = vst.msk [vmem:[#allocation3 + $0x30] sm:$0xff] %vm1952_vm9, %v1941_v40 }
 0x2c5   : > { %v2218_v43 = vld [vmem:[#allocation3 + $0x18] sm:$0xff] }
 0x2c6   : > { %2568 = vmatmul.mubr.msk.f32.gmra.mrb[2].mxu1 %vm2233_vm4, %v2218_v43  ;;  %v2088_v27 = vpop.permute.xlu0 %2087 }
 0x2c7   : > { %v1990_v19 = vpop.permute.xlu1 %1989 }
 0x2c8   : > { %v2219_v22 = vld [vmem:[#allocation3 + $0x20] sm:$0xff]  ;;  %2008 = vst.msk [vmem:[#allocation3 + $0x30] sm:$0xff] %vm2001_vm10, %v1990_v19 }
 0x2c9   : > { %2570 = vmatprep.mubr.msk.f32.mxu1 %vm2233_vm4, %v2219_v22 }
 0x2ca   : > { %v2137_v32 = vpop.permute.xlu0 %2136 }
 0x2cb   : > { %v2039_v47 = vpop.permute.xlu1 %2038 }
 0x2cc   : > { %2057 = vst.msk [vmem:[#allocation3 + $0x30] sm:$0xff] %vm2050_vm14, %v2039_v47 }
 0x2cd   : > { %2106 = vst.msk [vmem:[#allocation3 + $0x30] sm:$0xff] %vm2099_vm15, %v2088_v27 }
 0x2ce   : > { %2155 = vst.msk [vmem:[#allocation3 + $0x30] sm:$0xff] %vm2148_vm1, %v2137_v32  ;;  %v1845_v42 = vpop.permute.xlu0 %1844 }
 0x2cf   : > { %1862 = vst.msk [vmem:[#allocation3 + $0x38] sm:$0xff] %vm1854_vm7, %v1845_v42  ;;  %v2188_v46 = vpop.permute.xlu1 %2187 }
 0x2d2   : > { %v1894_v48 = vpop.permute.xlu0 %1893 }
 0x2d3   : > { %1911 = vst.msk [vmem:[#allocation3 + $0x38] sm:$0xff] %vm1903_vm8, %v1894_v48 }
 0x2d4   : > { %1960 = vst.msk [vmem:[#allocation3 + $0x38] sm:$0xff] %vm1952_vm9, %v1943_v38 }
 0x2d5   : > { %2009 = vst.msk [vmem:[#allocation3 + $0x38] sm:$0xff] %vm2001_vm10, %v1992_v39 }
 0x2d6   : > { %2058 = vst.msk [vmem:[#allocation3 + $0x38] sm:$0xff] %vm2050_vm14, %v2041_v26  ;;  %v2086_v50 = vpop.permute.xlu0 %2085 }
 0x2d7   : > { %2107 = vst.msk [vmem:[#allocation3 + $0x38] sm:$0xff] %vm2099_vm15, %v3431_v2  ;;  %2105 = vst.msk [vmem:[#allocation3 + $0x28] sm:$0xff] %vm2099_vm15, %v2086_v50 }
 0x2d8   : > { %2156 = vst.msk [vmem:[#allocation3 + $0x38] sm:$0xff] %vm2148_vm1, %v3435_v23 }
 0x2d9   : > { %2205 = vst.msk [vmem:[#allocation3 + $0x38] sm:$0xff] %vm2197_vm2, %v2188_v46 }
 0x2da   : > { %v2135_v44 = vpop.permute.xlu0 %2134  ;;  %2214 = vst.msk [vmem:[#allocation3 + $0x38] sm:$0xff] %vm2206_vm3, %v2736_v57 }
 0x2db   : > { %2154 = vst.msk [vmem:[#allocation3 + $0x28] sm:$0xff] %vm2148_vm1, %v2135_v44 }
 0x2de   : > { %v2184_v53 = vpop.permute.xlu0 %2183 }
 0x2df   : > { %2203 = vst.msk [vmem:[#allocation3 + $0x28] sm:$0xff] %vm2197_vm2, %v2184_v53 }
 0x2e0   : > { %2212 = vst.msk [vmem:[#allocation3 + $0x28] sm:$0xff] %vm2206_vm3, %v2736_v57 }
 0x2e1   : > { %v2222_v8 = vld [vmem:[#allocation3 + $0x38] sm:$0xff] }
 0x2e2   : > { %v2186_v2 = vpop.permute.xlu0 %2185 }
 0x2e3   : > { %2204 = vst.msk [vmem:[#allocation3 + $0x30] sm:$0xff] %vm2197_vm2, %v2186_v2 }
 0x2e4   : > { %2213 = vst.msk [vmem:[#allocation3 + $0x30] sm:$0xff] %vm2206_vm3, %v2736_v57 }
 0x2e7   : > { %v2220_v23 = vld [vmem:[#allocation3 + $0x28] sm:$0xff] }
 0x2e8   : > { %2571 = vmatmul.mubr.msk.f32.gmra.mrb[4].mxu1 %vm2233_vm4, %v2220_v23 }
 0x2eb   : > { %v2221_v54 = vld [vmem:[#allocation3 + $0x30] sm:$0xff] }
 0x2ec   : > { %2573 = vmatprep.mubr.msk.f32.mxu1 %vm2233_vm4, %v2221_v54 }
 0x2ed   : > { %2574 = vmatmul.mubr.msk.f32.gmra.mrb[6].mxu1 %vm2233_vm4, %v2222_v8 }
 0x36a   : > { %v2566_v55 = vpop.f32.mrb[0].mxu1 }
 0x36b   : > { %v2368_v41 = vmax.f32 %v2566_v55, 0.0  ;;  %v2328_v28 = vpop.f32.mrb[1].mxu1 }
 0x36c   : > { %v2367_v56 = vmax.f32 %v2328_v28, 0.0 }
 0x36d   : > { %2376 = vst.msk [vmem:[%s163_s4 + $0x8] sm:$0xff] %vm1051_vm0, %v2368_v41 }
 0x36e   : > { %2375 = vst.msk [vmem:[%s163_s4] sm:$0xff] %vm1051_vm0, %v2367_v56 }
 0x399   : > { %v2569_v57 = vpop.f32.mrb[2].mxu1 }
 0x39a   : > { %v2370_v49 = vmax.f32 %v2569_v57, 0.0  ;;  %v2338_v33 = vpop.f32.mrb[3].mxu1 }
 0x39b   : > { %v2369_v58 = vmax.f32 %v2338_v33, 0.0 }
 0x39c   : > { %2378 = vst.msk [vmem:[%s163_s4 + $0x18] sm:$0xff] %vm1051_vm0, %v2370_v49 }
 0x39d   : > { %2377 = vst.msk [vmem:[%s163_s4 + $0x10] sm:$0xff] %vm1051_vm0, %v2369_v58 }
 0x3bb   : > { %v2572_v52 = vpop.f32.mrb[4].mxu1 }
 0x3bc   : > { %v2372_v51 = vmax.f32 %v2572_v52, 0.0  ;;  %v2348_v59 = vpop.f32.mrb[5].mxu1 }
 0x3bd   : > { %v2371_v60 = vmax.f32 %v2348_v59, 0.0 }
 0x3be   : > { %2380 = vst.msk [vmem:[%s163_s4 + $0x28] sm:$0xff] %vm1051_vm0, %v2372_v51 }
 0x3bf   : > { %2379 = vst.msk [vmem:[%s163_s4 + $0x20] sm:$0xff] %vm1051_vm0, %v2371_v60 }
 0x3c0   : > { %v2575_v61 = vpop.f32.mrb[6].mxu1 }
 0x3c1   : > { %v2374_v37 = vmax.f32 %v2575_v61, 0.0  ;;  %v2358_v1 = vpop.f32.mrb[7].mxu1 }
 0x3c2   : > { %v2373_v62 = vmax.f32 %v2358_v1, 0.0 }
 0x3c3   : > { %2382 = vst.msk [vmem:[%s163_s4 + $0x38] sm:$0xff] %vm1051_vm0, %v2374_v37 }
 0x3c4   : > { %2381 = vst.msk [vmem:[%s163_s4 + $0x30] sm:$0xff] %vm1051_vm0, %v2373_v62 }
 0x3c5   : > { %2675 = shalt.err (!%p2672_p3)
}
 0x3c6   : > { %s2676_s20 = scalar_lea.hbm %s3600_s10, 1024  ;;  %s2680_s25 = scalar_lea.hbm %s3653_s3, 2048 }
 0x3c7   : > { %p2677_p4 = scmp.ne.s32.totalorder %s3600_s10, %s2676_s20  ;;  %p2681_p9 = scmp.lt.u32.totalorder %s3600_s10, %s3653_s3 }
 0x3c8   : > { %p2682_p10 = scmp.lt.u32.totalorder %s2680_s25, %s2676_s20  ;;  %p2684_p12 = scmp.lt.u32.totalorder %s2676_s20, %s3600_s10 }
 0x3c9   : > { %p2678_p7 = pnand %p2677_p4, %p2802_p5 }
 0x3ca   : > { %p2683_p11 = por %p2682_p10, %p2681_p9 }
 0x3cb   : > { %p2679_p8 = pneg %p2678_p7 }
 0x3cc   : > { %p2685_p13 = por %p2684_p12, %p2683_p11 }
 0x3ce   : > { %p2686_p0 = pnand %p2685_p13, %p2679_p8 }
 0x3d0   : > { %2689 = shalt.err (!%p2686_p0)
}
 0x3d1   : > { %s2743_s29 = smov 128  }
 0x3d2   : > { %2606 = dma.vmem_to_hbm [thread:$0]  (%p2802_p5), %s3602_s8, 1024, %s3600_s10, %s3608_s16, %s2743_s29, %s2743_s29, %s2729_s30  }
 0x3d3 PF: > { %p2612_p1 = scmp.ge.s32.totalorder %s2724_s15, 2  ;;  %s2412_s4 = sand.u32 1, %s2712_s12  }
 0x3d4   : > { %s2413_s6 = scalar_lea.sflag [#allocation5], %s2412_s4 }
 0x3d5   : > { %p2609_p2 = pnand %p2612_p1, %p2806_p6 }
 0x3d7   : > { %2707 = dma.done.wait (!%p2609_p2), %s2413_s6, 1024  }
 0x3d8   : > { %2709 = vsyncadd (!%p2609_p2), %s2413_s6, 4294966272  ;;  %p13_p3 = scmp.ge.s32.totalorder %s2789_s18, 4   ;;  %s3656_s12 = smov %s2716_s13 }
 0x3d9   : > { %s3657_s13 = smov %s2720_s14  ;;  %s3658_s14 = smov %s2800_s21 }
 0x3da   : > { %s3659_s15 = smov %s2789_s18  ;;  %15 = sbr.rel (!%p13_p3) target bundleno = 3 (0x3), region = 69 }
 0x3e1   :  { %2418 = vsyncpa [#allocation5], 1 }
 0x3e2   :  { %2420 = vsyncpa [#allocation5 + $0x1], 1 }

</bundles_post_ra>
